<compile_context>
chip_gen: v7x
topology: tpu7x:2x2x1
jax: 0.10.0
libtpu: 0.0.40
codegen_flags: <defaults>
</compile_context>

<pallas_src>
import jax
import jax.numpy as jnp
from jax.experimental import pallas as pl
from jax.experimental.pallas import tpu as pltpu

FEAT_DIM = 512           # encoder output dim (matches nn.Linear(512, num_classes))
NUM_CLASSES = 10
LANE = 128
_MiB = 1024 * 1024
_VMEM_CAP = 48 * _MiB            # keep the plan v7x-safe (64 MiB per TensorCore)
_W_RESIDENT_BUDGET = 12 * _MiB   # budget for keeping the bf16 encoder weight resident


def _round_up(x, m):
    return (x + m - 1) // m * m


def _make_kernel(w_resident, tk, num_k):
    """Grid = (batch_tiles, k_tiles); reduction (k) axis last."""

    def kernel(x_ref, we_ref, be_ref, wf_ref, bf_ref, o_ref, acc_ref):
        # x_ref : (tile_b, tk)              bf16 or f32 activation K-slice
        # we_ref: (d_pad, 512) resident | (tk, 512) streamed   bf16 encoder weight
        # be_ref: (1, 512)                  f32 encoder bias
        # wf_ref: (512, c_pad)              bf16 fc weight (pre-transposed, class-padded)
        # bf_ref: (1, c_pad)                f32 fc bias (class-padded)
        # o_ref : (tile_b, c_pad)           f32 lane-dense logits slab
        # acc_ref:(tile_b, 512)             f32 VMEM feature accumulator
        k = pl.program_id(1)

        @pl.when(k == 0)
        def _init():
            # Fold the encoder bias add into the mandatory accumulator init.
            acc_ref[...] = jnp.broadcast_to(be_ref[...], acc_ref.shape)

        if w_resident:
            # Whole (padded) weight lives in VMEM; take this step's K-slice.
            off = pl.multiple_of(k * tk, tk)
            w_blk = we_ref[pl.ds(off, tk), :]
        else:
            w_blk = we_ref[...]

        # Encoder partial matmul on the MXU (bf16 inputs, f32 accumulation).
        # .astype is a no-op when the wrapper already padded/cast x to bf16.
        acc_ref[...] += jnp.dot(
            x_ref[...].astype(jnp.bfloat16), w_blk,
            preferred_element_type=jnp.float32,
        )

        @pl.when(k == num_k - 1)
        def _finalize():
            # ReLU in place on the accumulator, then the fc head (bf16 in, f32 acc),
            # written once per batch tile as a lane-dense 128-wide slab.
            acc_ref[...] = jnp.maximum(acc_ref[...], 0.0)
            logits = jnp.dot(
                acc_ref[...].astype(jnp.bfloat16), wf_ref[...],
                preferred_element_type=jnp.float32,
            )
            o_ref[...] = logits + bf_ref[...]

    return kernel


def prepare_params(w_enc, b_enc, w_fc, b_fc, *, tk=2048):
    """One-time packing of the frozen encoder + fc parameters.

    Hoists the bf16 cast / zero-padding of the frozen weights out of the per-call
    forward so each forward only streams the already-packed bytes from HBM.
    """
    d_in = w_enc.shape[0]
    num_classes = w_fc.shape[1]
    # Don't pad the reduction dim past what the model actually has; keep tk a
    # multiple of 256 (lane-dense x block, sublane-packed bf16 weight block).
    tk = min(int(tk), _round_up(d_in, 256))
    d_pad = _round_up(d_in, tk)
    c_pad = _round_up(num_classes, LANE)   # lane-dense output slab

    # Frozen encoder -> no gradients flow through it.
    w_enc = jax.lax.stop_gradient(w_enc)
    b_enc = jax.lax.stop_gradient(b_enc)

    we_bf = jnp.pad(w_enc.astype(jnp.bfloat16), ((0, d_pad - d_in), (0, 0)))
    be = jnp.reshape(b_enc, (1, FEAT_DIM)).astype(jnp.float32)
    wf_bf = jnp.pad(w_fc, ((0, 0), (0, c_pad - num_classes))).astype(jnp.bfloat16)
    bf = jnp.pad(jnp.reshape(b_fc, (1, num_classes)),
                 ((0, 0), (0, c_pad - num_classes))).astype(jnp.float32)

    return dict(we_bf=we_bf, b_enc=be, wf_bf=wf_bf, bf=bf,
                d_in=d_in, d_pad=d_pad, tk=tk,
                num_classes=num_classes, c_pad=c_pad)


def linear_classifier_forward(x_nchw, params, *, tile_b=None):
    """x_nchw: [B, C, H, W] float32.  Returns logits [B, num_classes] float32."""
    B = x_nchw.shape[0]
    d_in = params["d_in"]
    assert x_nchw.shape[1] * x_nchw.shape[2] * x_nchw.shape[3] == d_in
    tk, d_pad, c_pad = params["tk"], params["d_pad"], params["c_pad"]

    # ---- batch tiling: fill the MXU for big B, keep >= 2 tiles for v7x megacore ----
    if tile_b is None:
        if B >= 512:
            tile_b = 256
        elif B >= 64:
            tile_b = _round_up((B + 1) // 2, 16)   # >= 2 parallel batch tiles
        else:
            tile_b = _round_up(max(B, 1), 16)
    b_pad = _round_up(B, tile_b)
    num_b = b_pad // tile_b
    num_k = d_pad // tk

    # ---- activations: in-kernel bf16 cast when no padding is required ----
    x_flat = x_nchw.reshape(B, d_in)
    if b_pad == B and d_pad == d_in:
        x_in = x_flat                                   # f32 straight from HBM
    else:
        x_in = jnp.pad(x_flat.astype(jnp.bfloat16),     # cast first, pad in bf16
                       ((0, b_pad - B), (0, d_pad - d_in)))

    # ---- encoder weight: resident in VMEM when it fits the v7x-safe budget ----
    w_bytes_total = d_pad * FEAT_DIM * 2
    w_resident = w_bytes_total <= _W_RESIDENT_BUDGET
    if w_resident:
        we_spec = pl.BlockSpec((d_pad, FEAT_DIM), lambda b, k: (0, 0))
        w_vmem = w_bytes_total                          # single buffer, constant index
    else:
        we_spec = pl.BlockSpec((tk, FEAT_DIM), lambda b, k: (k, 0))
        w_vmem = 2 * tk * FEAT_DIM * 2                  # double-buffered K-slices

    # ---- size the scoped-VMEM limit to the actual plan (capped v7x-safe) ----
    x_vmem = 2 * tile_b * tk * x_in.dtype.itemsize
    param_vmem = 2 * (FEAT_DIM * 4 + FEAT_DIM * c_pad * 2 + c_pad * 4)
    out_vmem = 2 * tile_b * c_pad * 4
    acc_vmem = tile_b * FEAT_DIM * 4
    plan = x_vmem + w_vmem + param_vmem + out_vmem + acc_vmem
    vmem_limit = int(min(_VMEM_CAP, max(32 * _MiB, 2 * plan)))

    kernel = _make_kernel(w_resident, tk, num_k)

    out = pl.pallas_call(
        kernel,
        out_shape=jax.ShapeDtypeStruct((b_pad, c_pad), jnp.float32),
        grid_spec=pltpu.PrefetchScalarGridSpec(
            num_scalar_prefetch=0,
            grid=(num_b, num_k),                                       # reduction last
            in_specs=[
                pl.BlockSpec((tile_b, tk), lambda b, k: (b, k)),       # x
                we_spec,                                               # w_enc
                pl.BlockSpec((1, FEAT_DIM), lambda b, k: (0, 0)),      # b_enc
                pl.BlockSpec((FEAT_DIM, c_pad), lambda b, k: (0, 0)),  # w_fc
                pl.BlockSpec((1, c_pad), lambda b, k: (0, 0)),         # b_fc
            ],
            out_specs=pl.BlockSpec((tile_b, c_pad), lambda b, k: (b, 0)),
            scratch_shapes=[pltpu.VMEM((tile_b, FEAT_DIM), jnp.float32)],
        ),
        compiler_params=pltpu.CompilerParams(
            dimension_semantics=("parallel", "arbitrary"),
            vmem_limit_bytes=vmem_limit,
        ),
    )(x_in, params["we_bf"], params["b_enc"], params["wf_bf"], params["bf"])

    return out[:B, :params["num_classes"]]


def init_params(key, d_in, num_classes=NUM_CLASSES):
    """Deterministic parameter init mimicking nn.Linear's U(-1/sqrt(fan_in), ...)."""
    k_we, k_be, k_wf, k_bf = jax.random.split(key, 4)
    bound_enc = 1.0 / jnp.sqrt(jnp.float32(d_in))
    bound_fc = 1.0 / jnp.sqrt(jnp.float32(FEAT_DIM))
    # TODO(synk): the real SimCLR encoder is an arbitrary frozen nn.Module; it is stood
    # in by this deterministic frozen linear(flatten->512)+ReLU projection.
    w_enc = jax.random.uniform(k_we, (d_in, FEAT_DIM), jnp.float32, -bound_enc, bound_enc)
    b_enc = jax.random.uniform(k_be, (1, FEAT_DIM), jnp.float32, -bound_enc, bound_enc)
    # fc head: PyTorch stores [out, in]; pre-transposed here to [in, out] = [512, C]
    w_fc = jax.random.uniform(k_wf, (FEAT_DIM, num_classes), jnp.float32, -bound_fc, bound_fc)
    b_fc = jax.random.uniform(k_bf, (1, num_classes), jnp.float32, -bound_fc, bound_fc)
    return w_enc, b_enc, w_fc, b_fc


if __name__ == "__main__":
    key = jax.random.PRNGKey(0)
    k_x, k_p = jax.random.split(key)

    B, C, H, W = 2, 4, 16, 16          # small NCHW input
    d_in = C * H * W                   # 1024 flattened features

    x = jax.random.normal(k_x, (B, C, H, W), jnp.float32)
    w_enc, b_enc, w_fc, b_fc = init_params(k_p, d_in)

    params = prepare_params(w_enc, b_enc, w_fc, b_fc)   # one-time frozen-weight packing
    logits = linear_classifier_forward(x, params)
    logits = jax.block_until_ready(logits)

    # Pure-JAX reference of the same math (MXU inputs quantized to bf16 like the
    # kernel, f32 accumulation for both matmuls).
    x_flat = x.reshape(B, d_in)
    x_q = x_flat.astype(jnp.bfloat16).astype(jnp.float32)
    we_q = w_enc.astype(jnp.bfloat16).astype(jnp.float32)
    feats = jnp.maximum(x_q @ we_q + b_enc, 0.0)
    feats_q = feats.astype(jnp.bfloat16).astype(jnp.float32)
    wf_q = w_fc.astype(jnp.bfloat16).astype(jnp.float32)
    ref = feats_q @ wf_q + b_fc

    assert logits.shape == (B, NUM_CLASSES)
    assert jnp.allclose(logits, ref, atol=2e-2, rtol=2e-2)

    print("KERNEL_OK")
</pallas_src>

<mosaic_0001>
module attributes {stable_mosaic.version = 11 : i64} {
  func.func @kernel(%arg0: i32, %arg1: i32, %arg2: memref<16x1024xbf16, #tpu.memory_space<vmem>>, %arg3: memref<1024x512xbf16, #tpu.memory_space<vmem>>, %arg4: memref<1x512xf32, #tpu.memory_space<vmem>>, %arg5: memref<512x128xbf16, #tpu.memory_space<vmem>>, %arg6: memref<1x128xf32, #tpu.memory_space<vmem>>, %arg7: memref<16x128xf32, #tpu.memory_space<vmem>>, %arg8: memref<16x512xf32, #tpu.memory_space<vmem>>) attributes {dimension_semantics = [#tpu.dimension_semantics<parallel>, #tpu.dimension_semantics<arbitrary>], iteration_bounds = array<i64: 1, 1>, scalar_prefetch = 0 : i64, scratch_operands = 1 : i64, tpu.core_type = #tpu.core_type<tc>, window_params = [{transform_indices = @transform_0, window_bounds = array<i64: 16, 1024>}, {pipeline_mode = #tpu.pipeline_mode<synchronous>, transform_indices = @transform_1, window_bounds = array<i64: 1024, 512>}, {pipeline_mode = #tpu.pipeline_mode<synchronous>, transform_indices = @transform_2, window_bounds = array<i64: 1, 512>}, {pipeline_mode = #tpu.pipeline_mode<synchronous>, transform_indices = @transform_3, window_bounds = array<i64: 512, 128>}, {pipeline_mode = #tpu.pipeline_mode<synchronous>, transform_indices = @transform_4, window_bounds = array<i64: 1, 128>}, {transform_indices = @transform_5, window_bounds = array<i64: 16, 128>}]} {
    %c0_i32 = arith.constant 0 : i32
    %0 = arith.cmpi eq, %arg1, %c0_i32 : i32
    %1 = arith.extui %0 : i1 to i32
    %c0_i32_0 = arith.constant 0 : i32
    %2 = arith.cmpi ne, %1, %c0_i32_0 : i32
    scf.if %2 {
      %c0_9 = arith.constant 0 : index
      %c0_10 = arith.constant 0 : index
      %15 = vector.load %arg4[%c0_9, %c0_10] : memref<1x512xf32, #tpu.memory_space<vmem>>, vector<1x512xf32>
      %16 = vector.shape_cast %15 : vector<1x512xf32> to vector<1x512xf32>
      %17 = vector.broadcast %16 : vector<1x512xf32> to vector<16x512xf32>
      %c0_11 = arith.constant 0 : index
      %c0_12 = arith.constant 0 : index
      %18 = vector.load %arg8[%c0_11, %c0_12] : memref<16x512xf32, #tpu.memory_space<vmem>>, vector<16x512xf32>
      tpu.vector_store %arg8[%c0_11, %c0_12], %17 {strides = array<i32>} : memref<16x512xf32, #tpu.memory_space<vmem>>, vector<16x512xf32>,
    } else {
    }
    %c1024_i32 = arith.constant 1024 : i32
    %3 = arith.muli %arg1, %c1024_i32 : i32
    %4 = tpu.assume_multiple %3, 1024 : i32
    %5 = arith.index_cast %4 : i32 to index
    %c0 = arith.constant 0 : index
    %6 = vector.load %arg3[%5, %c0] : memref<1024x512xbf16, #tpu.memory_space<vmem>>, vector<1024x512xbf16>
    %c0_1 = arith.constant 0 : index
    %c0_2 = arith.constant 0 : index
    %7 = vector.load %arg8[%c0_1, %c0_2] : memref<16x512xf32, #tpu.memory_space<vmem>>, vector<16x512xf32>
    %c0_3 = arith.constant 0 : index
    %c0_4 = arith.constant 0 : index
    %8 = vector.load %arg2[%c0_3, %c0_4] : memref<16x1024xbf16, #tpu.memory_space<vmem>>, vector<16x1024xbf16>
    %cst = arith.constant dense<0.000000e+00> : vector<16x512xf32>
    %9 = tpu.matmul %8, %6, %cst {dimension_numbers = #tpu.dot_dimension_numbers<[1], [0], [0], [1], [0, 0, 1, 1], [], []>} : vector<16x1024xbf16>, vector<1024x512xbf16>, vector<16x512xf32> -> vector<16x512xf32>
    %10 = arith.addf %7, %9 : vector<16x512xf32>
    %c0_5 = arith.constant 0 : index
    %c0_6 = arith.constant 0 : index
    %11 = vector.load %arg8[%c0_5, %c0_6] : memref<16x512xf32, #tpu.memory_space<vmem>>, vector<16x512xf32>
    tpu.vector_store %arg8[%c0_5, %c0_6], %10 {strides = array<i32>} : memref<16x512xf32, #tpu.memory_space<vmem>>, vector<16x512xf32>,
    %c0_i32_7 = arith.constant 0 : i32
    %12 = arith.cmpi eq, %arg1, %c0_i32_7 : i32
    %13 = arith.extui %12 : i1 to i32
    %c0_i32_8 = arith.constant 0 : i32
    %14 = arith.cmpi ne, %13, %c0_i32_8 : i32
    scf.if %14 {
      %c0_9 = arith.constant 0 : index
      %c0_10 = arith.constant 0 : index
      %15 = vector.load %arg8[%c0_9, %c0_10] : memref<16x512xf32, #tpu.memory_space<vmem>>, vector<16x512xf32>
      %cst_11 = arith.constant 0.000000e+00 : f32
      %16 = vector.broadcast %cst_11 : f32 to vector<16x512xf32>
      %17 = arith.maximumf %15, %16 : vector<16x512xf32>
      %c0_12 = arith.constant 0 : index
      %c0_13 = arith.constant 0 : index
      %18 = vector.load %arg8[%c0_12, %c0_13] : memref<16x512xf32, #tpu.memory_space<vmem>>, vector<16x512xf32>
      tpu.vector_store %arg8[%c0_12, %c0_13], %17 {strides = array<i32>} : memref<16x512xf32, #tpu.memory_space<vmem>>, vector<16x512xf32>,
      %c0_14 = arith.constant 0 : index
      %c0_15 = arith.constant 0 : index
      %19 = vector.load %arg8[%c0_14, %c0_15] : memref<16x512xf32, #tpu.memory_space<vmem>>, vector<16x512xf32>
      %20 = arith.truncf %19 : vector<16x512xf32> to vector<16x512xbf16>
      %c0_16 = arith.constant 0 : index
      %c0_17 = arith.constant 0 : index
      %21 = vector.load %arg5[%c0_16, %c0_17] : memref<512x128xbf16, #tpu.memory_space<vmem>>, vector<512x128xbf16>
      %cst_18 = arith.constant dense<0.000000e+00> : vector<16x128xf32>
      %22 = tpu.matmul %20, %21, %cst_18 {dimension_numbers = #tpu.dot_dimension_numbers<[1], [0], [0], [1], [0, 0, 1, 1], [], []>} : vector<16x512xbf16>, vector<512x128xbf16>, vector<16x128xf32> -> vector<16x128xf32>
      %c0_19 = arith.constant 0 : index
      %c0_20 = arith.constant 0 : index
      %23 = vector.load %arg6[%c0_19, %c0_20] : memref<1x128xf32, #tpu.memory_space<vmem>>, vector<1x128xf32>
      %24 = vector.broadcast %23 : vector<1x128xf32> to vector<16x128xf32>
      %25 = arith.addf %22, %24 : vector<16x128xf32>
      %c0_21 = arith.constant 0 : index
      %c0_22 = arith.constant 0 : index
      %26 = vector.load %arg7[%c0_21, %c0_22] : memref<16x128xf32, #tpu.memory_space<vmem>>, vector<16x128xf32>
      tpu.vector_store %arg7[%c0_21, %c0_22], %25 {strides = array<i32>} : memref<16x128xf32, #tpu.memory_space<vmem>>, vector<16x128xf32>,
    } else {
    }
    return
  }
  func.func @transform_0(%arg0: i32, %arg1: i32) -> (i32, i32) {
    %c0_i32 = arith.constant 0 : i32
    return %arg0, %arg1 : i32, i32
  }
  func.func @transform_1(%arg0: i32, %arg1: i32) -> (i32, i32) {
    %c0_i32 = arith.constant 0 : i32
    %c0_i32_0 = arith.constant 0 : i32
    %c0_i32_1 = arith.constant 0 : i32
    return %c0_i32, %c0_i32_0 : i32, i32
  }
  func.func @transform_2(%arg0: i32, %arg1: i32) -> (i32, i32) {
    %c0_i32 = arith.constant 0 : i32
    %c0_i32_0 = arith.constant 0 : i32
    %c0_i32_1 = arith.constant 0 : i32
    return %c0_i32, %c0_i32_0 : i32, i32
  }
  func.func @transform_3(%arg0: i32, %arg1: i32) -> (i32, i32) {
    %c0_i32 = arith.constant 0 : i32
    %c0_i32_0 = arith.constant 0 : i32
    %c0_i32_1 = arith.constant 0 : i32
    return %c0_i32, %c0_i32_0 : i32, i32
  }
  func.func @transform_4(%arg0: i32, %arg1: i32) -> (i32, i32) {
    %c0_i32 = arith.constant 0 : i32
    %c0_i32_0 = arith.constant 0 : i32
    %c0_i32_1 = arith.constant 0 : i32
    return %c0_i32, %c0_i32_0 : i32, i32
  }
  func.func @transform_5(%arg0: i32, %arg1: i32) -> (i32, i32) {
    %c0_i32 = arith.constant 0 : i32
    %c0_i32_0 = arith.constant 0 : i32
    return %arg0, %c0_i32 : i32, i32
  }
}

</mosaic_0001>

<bundles_post_ra>
// kernel: tpu_custom_call.1
= control target key start
LH: loop header
LB: loop body
LE: loop exit
PB: predicated region body
PF: predicated region fallthrough
CT: control target
= control target key end

     0   :  { %10 = vsyncpa [#allocation4], 0  ;;  %s3468_s0 = inlined_call_operand.hbm [shape: bf16[16,1024], index: 0, kind: input, shape index: {}]   ;;  %s3469_s1 = inlined_call_operand.hbm [shape: bf16[1024,512], index: 1, kind: input, shape index: {}]   ;;  %s3470_s2 = inlined_call_operand.vmem [shape: f32[1,512], index: 2, kind: input, shape index: {}]   ;;  %s3471_s3 = inlined_call_operand.hbm [shape: bf16[512,128], index: 3, kind: input, shape index: {}]   ;;  %s3472_s4 = inlined_call_operand.vmem [shape: f32[1,128], index: 4, kind: input, shape index: {}]   ;;  %s3473_s5 = inlined_call_operand.hbm [shape: f32[16,128], index: 5, kind: output, shape index: {}]  }
   0x1   :  { %11 = vsyncpa [#allocation7], 0 }
   0x2   :  { %12 = vsyncpa [#allocation5], 0  ;;  %s3348_s18 = smov [#allocation6]   ;;  %s3254_s22 = scalar_lea.hbm %s3469_s1, 32768 }
   0x3   :  { %s30_s19 = sshll.u32 %s3348_s18, 4  ;;  %p3255_p0 = scmp.ne.s32.totalorder %s3469_s1, %s3254_s22  ;;  %s31_s19 = int_to_ptr.vmem [resolvable:$true] %s30_s19 }
   0x4   :  { %p3258_p1 = scmp.lt.u32.totalorder %s3254_s22, %s3469_s1 }
   0x6   :  { %p3260_p2 = pnand %p3258_p1, %p3255_p0 }
   0x8   :  { %3263 = shalt.err (!%p3260_p2)
}
   0x9   :  { %s3264_s27 = scalar_lea.vmem %s31_s19, 32768  ;;  %p3269_p4 = scmp.lt.s32.totalorder %s31_s19, %s31_s19 }
   0xa   :  { %p3265_p3 = scmp.ne.s32.totalorder %s31_s19, %s3264_s27  ;;  %p3270_p5 = scmp.lt.s32.totalorder %s3264_s27, %s3264_s27 }
   0xc   :  { %p3271_p6 = por %p3270_p5, %p3269_p4 }
   0xe   :  { %p3272_p7 = pnand %p3271_p6, %p3265_p3 }
  0x10   :  { %3275 = shalt.err (!%p3272_p7)
}
  0x11   :  { %s3349_s28 = smov 256   ;;  %s3350_s29 = smov 16  }
  0x12   :  { %36 = dma.hbm_to_vmem [thread:$0]  %s3469_s1, 32768, %s31_s19, [#allocation7], %s3349_s28, %s3349_s28, %s3350_s29  }
  0x13   :  { %s3351_s7 = smov [#allocation3]   ;;  %s3276_s11 = scalar_lea.hbm %s3468_s0, 1024 }
  0x14   :  { %s18_s8 = sshll.u32 %s3351_s7, 4  ;;  %p3277_p8 = scmp.ne.s32.totalorder %s3468_s0, %s3276_s11  ;;  %s19_s8 = int_to_ptr.vmem [resolvable:$true] %s18_s8 }
  0x15   :  { %p3280_p9 = scmp.lt.u32.totalorder %s3276_s11, %s3468_s0 }
  0x17   :  { %p3282_p10 = pnand %p3280_p9, %p3277_p8 }
  0x19   :  { %3285 = shalt.err (!%p3282_p10)
}
  0x1a   :  { %s3286_s16 = scalar_lea.vmem %s19_s8, 1024  ;;  %p3291_p12 = scmp.lt.s32.totalorder %s19_s8, %s19_s8 }
  0x1b   :  { %p3287_p11 = scmp.ne.s32.totalorder %s19_s8, %s3286_s16  ;;  %p3292_p13 = scmp.lt.s32.totalorder %s3286_s16, %s3286_s16 }
  0x1d   :  { %p3293_p0 = por %p3292_p13, %p3291_p12 }
  0x1f   :  { %p3294_p1 = pnand %p3293_p0, %p3287_p11 }
  0x21   :  { %3297 = shalt.err (!%p3294_p1)
}
  0x22   :  { %s3352_s1 = smov 512   ;;  %s3353_s17 = smov 32  }
  0x23   :  { %24 = dma.hbm_to_vmem [thread:$0]  %s3468_s0, 1024, %s19_s8, [#allocation4], %s3352_s1, %s3352_s1, %s3353_s17  }
  0x24   :  { %s3354_s20 = smov [#allocation8]   ;;  %s3298_s24 = scalar_lea.hbm %s3471_s3, 4096 }
  0x25   :  { %s44_s21 = sshll.u32 %s3354_s20, 4  ;;  %p3299_p2 = scmp.ne.s32.totalorder %s3471_s3, %s3298_s24  ;;  %s45_s21 = int_to_ptr.vmem [resolvable:$true] %s44_s21 }
  0x26   :  { %p3302_p3 = scmp.lt.u32.totalorder %s3298_s24, %s3471_s3 }
  0x28   :  { %p3304_p4 = pnand %p3302_p3, %p3299_p2 }
  0x2a   :  { %3307 = shalt.err (!%p3304_p4)
}
  0x2b   :  { %s3308_s29 = scalar_lea.vmem %s45_s21, 4096  ;;  %p3313_p6 = scmp.lt.s32.totalorder %s45_s21, %s45_s21 }
  0x2c   :  { %p3309_p5 = scmp.ne.s32.totalorder %s45_s21, %s3308_s29  ;;  %p3314_p7 = scmp.lt.s32.totalorder %s3308_s29, %s3308_s29 }
  0x2e   :  { %p3315_p8 = por %p3314_p7, %p3313_p6 }
  0x30   :  { %p3316_p9 = pnand %p3315_p8, %p3309_p5 }
  0x32   :  { %3319 = shalt.err (!%p3316_p9)
}
  0x33   :  { %s3355_s0 = smov 64   ;;  %s3356_s30 = smov 4  }
  0x34   :  { %50 = dma.hbm_to_vmem [thread:$0]  %s3471_s3, 4096, %s45_s21, [#allocation7], %s3355_s0, %s3355_s0, %s3356_s30  }
  0x35   :  { %3342 = dma.done.wait [#allocation4], 1024  }
  0x36   :  { %3343 = vsyncadd [#allocation4], 4294966272 }
  0x37   :  { %3344 = dma.done.wait [#allocation7], 36864  }
  0x38   :  { %3345 = vsyncadd [#allocation7], 4294930432  ;;  %v2838_v0 = vld [vmem:[#allocation6 + $0x4] ss:$16 sps:$4 sm:$0xff]   ;;  %v2840_v1 = vld [vmem:[#allocation6 + $0xc] ss:$16 sps:$4 sm:$0xff]  }
  0x39   :  { %1695 = vmatprep.subr.bf16.mxu0 %v2838_v0  ;;  %v2842_v2 = vld [vmem:[#allocation6] ss:$16 sps:$4 sm:$0xff]   ;;  %v2843_v3 = vld [vmem:[#allocation6 + $0x8] ss:$16 sps:$4 sm:$0xff]   ;;  %1867 = vmatprep.subr.bf16.mxu1 %v2840_v1  ;;  %v2844_v4 = vld [vmem:[#allocation6 + $0x24] ss:$16 sps:$4 sm:$0xff]  }
  0x3a   :  { %1696 = vmatpush1.bf16.msra.mxu0 %v2842_v2  ;;  %1868 = vmatpush1.bf16.msra.mxu1 %v2843_v3  ;;  %v2846_v5 = vld [vmem:[#allocation6 + $0x2c] ss:$16 sps:$4 sm:$0xff]   ;;  %v2848_v6 = vld [vmem:[#allocation6 + $0x20] ss:$16 sps:$4 sm:$0xff]   ;;  %v2849_v7 = vld [vmem:[#allocation6 + $0x28] ss:$16 sps:$4 sm:$0xff]  }
  0x3b   :  { %1697 = vmatprep.subr.bf16.mxu0 %v2844_v4  ;;  %1869 = vmatprep.subr.bf16.mxu1 %v2846_v5  ;;  %v2850_v8 = vld [vmem:[#allocation6 + $0x44] ss:$16 sps:$4 sm:$0xff]   ;;  %v2852_v9 = vld [vmem:[#allocation6 + $0x4c] ss:$16 sps:$4 sm:$0xff]   ;;  %v2854_v10 = vld [vmem:[#allocation6 + $0x40] ss:$16 sps:$4 sm:$0xff]  }
  0x3c   :  { %v2855_v11 = vld [vmem:[#allocation6 + $0x48] ss:$16 sps:$4 sm:$0xff]   ;;  %v2856_v12 = vld [vmem:[#allocation6 + $0x64] ss:$16 sps:$4 sm:$0xff]   ;;  %v2858_v13 = vld [vmem:[#allocation6 + $0x6c] ss:$16 sps:$4 sm:$0xff]  }
  0x3d   :  { %v2860_v14 = vld [vmem:[#allocation6 + $0x60] ss:$16 sps:$4 sm:$0xff]   ;;  %v2861_v15 = vld [vmem:[#allocation6 + $0x68] ss:$16 sps:$4 sm:$0xff]   ;;  %v2862_v16 = vld [vmem:[#allocation6 + $0x84] ss:$16 sps:$4 sm:$0xff]  }
  0x3e   :  { %1698 = vmatpush1.bf16.msra.mxu0 %v2848_v6  ;;  %1870 = vmatpush1.bf16.msra.mxu1 %v2849_v7  ;;  %v2864_v17 = vld [vmem:[#allocation6 + $0x8c] ss:$16 sps:$4 sm:$0xff]   ;;  %v2866_v18 = vld [vmem:[#allocation6 + $0x80] ss:$16 sps:$4 sm:$0xff]   ;;  %v2867_v19 = vld [vmem:[#allocation6 + $0x88] ss:$16 sps:$4 sm:$0xff]  }
  0x3f   :  { %1699 = vmatprep.subr.bf16.mxu0 %v2850_v8  ;;  %1871 = vmatprep.subr.bf16.mxu1 %v2852_v9  ;;  %v2868_v20 = vld [vmem:[#allocation6 + $0xa4] ss:$16 sps:$4 sm:$0xff]   ;;  %v2870_v21 = vld [vmem:[#allocation6 + $0xac] ss:$16 sps:$4 sm:$0xff]   ;;  %v2872_v22 = vld [vmem:[#allocation6 + $0xa0] ss:$16 sps:$4 sm:$0xff]  }
  0x40   :  { %v2873_v23 = vld [vmem:[#allocation6 + $0xa8] ss:$16 sps:$4 sm:$0xff]   ;;  %v2874_v24 = vld [vmem:[#allocation6 + $0xc4] ss:$16 sps:$4 sm:$0xff]   ;;  %v2876_v25 = vld [vmem:[#allocation6 + $0xcc] ss:$16 sps:$4 sm:$0xff]  }
  0x41   :  { %v2878_v26 = vld [vmem:[#allocation6 + $0xc0] ss:$16 sps:$4 sm:$0xff]   ;;  %v2879_v27 = vld [vmem:[#allocation6 + $0xc8] ss:$16 sps:$4 sm:$0xff]   ;;  %v2880_v28 = vld [vmem:[#allocation6 + $0xe4] ss:$16 sps:$4 sm:$0xff]  }
  0x42   :  { %1700 = vmatpush1.bf16.msra.mxu0 %v2854_v10  ;;  %1872 = vmatpush1.bf16.msra.mxu1 %v2855_v11  ;;  %v2882_v29 = vld [vmem:[#allocation6 + $0xec] ss:$16 sps:$4 sm:$0xff]   ;;  %v2884_v30 = vld [vmem:[#allocation6 + $0xe0] ss:$16 sps:$4 sm:$0xff]   ;;  %v2885_v31 = vld [vmem:[#allocation6 + $0xe8] ss:$16 sps:$4 sm:$0xff]  }
  0x43   :  { %1701 = vmatprep.subr.bf16.mxu0 %v2856_v12  ;;  %1873 = vmatprep.subr.bf16.mxu1 %v2858_v13  ;;  %v2886_v32 = vld [vmem:[#allocation6 + $0x104] ss:$16 sps:$4 sm:$0xff]   ;;  %v2888_v33 = vld [vmem:[#allocation6 + $0x10c] ss:$16 sps:$4 sm:$0xff]   ;;  %v2890_v34 = vld [vmem:[#allocation6 + $0x100] ss:$16 sps:$4 sm:$0xff]  }
  0x44   :  { %v2891_v35 = vld [vmem:[#allocation6 + $0x108] ss:$16 sps:$4 sm:$0xff]   ;;  %v2892_v36 = vld [vmem:[#allocation6 + $0x124] ss:$16 sps:$4 sm:$0xff]   ;;  %v2894_v37 = vld [vmem:[#allocation6 + $0x12c] ss:$16 sps:$4 sm:$0xff]  }
  0x45   :  { %v2896_v38 = vld [vmem:[#allocation6 + $0x120] ss:$16 sps:$4 sm:$0xff]   ;;  %v2897_v39 = vld [vmem:[#allocation6 + $0x128] ss:$16 sps:$4 sm:$0xff]   ;;  %v2898_v40 = vld [vmem:[#allocation6 + $0x144] ss:$16 sps:$4 sm:$0xff]  }
  0x46   :  { %1702 = vmatpush1.bf16.msra.mxu0 %v2860_v14  ;;  %1874 = vmatpush1.bf16.msra.mxu1 %v2861_v15  ;;  %v2900_v41 = vld [vmem:[#allocation6 + $0x14c] ss:$16 sps:$4 sm:$0xff]   ;;  %v2902_v42 = vld [vmem:[#allocation6 + $0x140] ss:$16 sps:$4 sm:$0xff]   ;;  %v2903_v43 = vld [vmem:[#allocation6 + $0x148] ss:$16 sps:$4 sm:$0xff]  }
  0x47   :  { %1703 = vmatprep.subr.bf16.mxu0 %v2862_v16  ;;  %1875 = vmatprep.subr.bf16.mxu1 %v2864_v17  ;;  %v2904_v44 = vld [vmem:[#allocation6 + $0x164] ss:$16 sps:$4 sm:$0xff]   ;;  %v2906_v45 = vld [vmem:[#allocation6 + $0x16c] ss:$16 sps:$4 sm:$0xff]   ;;  %v2908_v48 = vld [vmem:[#allocation6 + $0x160] ss:$16 sps:$4 sm:$0xff]  }
  0x48   :  { %v367_v46 = vld [vmem:[#allocation3] sm:$0xff]  ;;  %v2909_v49 = vld [vmem:[#allocation6 + $0x168] ss:$16 sps:$4 sm:$0xff]   ;;  %v2912_v52 = vld [vmem:[#allocation6 + $0x18c] ss:$16 sps:$4 sm:$0xff]   ;;  %s3357_s10 = smov [#allocation9]  }
  0x49   :  { %v371_v47 = vld [vmem:[#allocation3 + $0x20] sm:$0xff]  ;;  %v2915_v54 = vld [vmem:[#allocation6 + $0x188] ss:$16 sps:$4 sm:$0xff]   ;;  %v2918_v56 = vld [vmem:[#allocation6 + $0x1ac] ss:$16 sps:$4 sm:$0xff]   ;;  %s2446_s11 = sshll.u32 %s3357_s10, 4  ;;  %s2447_s11 = int_to_ptr.vmem [resolvable:$true] %s2446_s11 }
  0x4a   :  { %1704 = vmatpush1.bf16.msra.mxu0 %v2866_v18  ;;  %1876 = vmatpush1.bf16.msra.mxu1 %v2867_v19  ;;  %v2462_v50 = vcombine.high %v367_v46, %v371_v47  ;;  %v2910_v51 = vld [vmem:[#allocation6 + $0x184] ss:$16 sps:$4 sm:$0xff]   ;;  %v2914_v53 = vld [vmem:[#allocation6 + $0x180] ss:$16 sps:$4 sm:$0xff]   ;;  %v2921_v58 = vld [vmem:[#allocation6 + $0x1a8] ss:$16 sps:$4 sm:$0xff]   ;;  %v2461_v5 = vcombine.low %v367_v46, %v371_v47  ;;  %p3325_p11 = scmp.lt.s32.totalorder %s2447_s11, %s2447_s11 }
  0x4b   :  { %1705 = vmatprep.subr.bf16.mxu0 %v2868_v20  ;;  %1877 = vmatprep.subr.bf16.mxu1 %v2870_v21  ;;  %v2916_v55 = vld [vmem:[#allocation6 + $0x1a4] ss:$16 sps:$4 sm:$0xff]   ;;  %v2920_v57 = vld [vmem:[#allocation6 + $0x1a0] ss:$16 sps:$4 sm:$0xff]   ;;  %v2924_v60 = vld [vmem:[#allocation6 + $0x1cc] ss:$16 sps:$4 sm:$0xff]  }
  0x4c   :  { %1727 = vmatprep.mubr.bf16.mxu0 %v2462_v50  ;;  %1899 = vmatprep.mubr.bf16.mxu1 %v2462_v50  ;;  %v2922_v59 = vld [vmem:[#allocation6 + $0x1c4] ss:$16 sps:$4 sm:$0xff]   ;;  %v2926_v61 = vld [vmem:[#allocation6 + $0x1c0] ss:$16 sps:$4 sm:$0xff]   ;;  %v2927_v62 = vld [vmem:[#allocation6 + $0x1c8] ss:$16 sps:$4 sm:$0xff]  }
  0x4d   :  { %v2928_v63 = vld [vmem:[#allocation6 + $0x1e4] ss:$16 sps:$4 sm:$0xff]   ;;  %v2930_v0 = vld [vmem:[#allocation6 + $0x1ec] ss:$16 sps:$4 sm:$0xff]   ;;  %v2932_v1 = vld [vmem:[#allocation6 + $0x1e0] ss:$16 sps:$4 sm:$0xff]  }
  0x4e   :  { %1706 = vmatpush1.bf16.msra.mxu0 %v2872_v22  ;;  %1878 = vmatpush1.bf16.msra.mxu1 %v2873_v23  ;;  %v2933_v2 = vld [vmem:[#allocation6 + $0x1e8] ss:$16 sps:$4 sm:$0xff]   ;;  %v2936_v3 = vld [vmem:[#allocation6 + $0x204] ss:$16 sps:$4 sm:$0xff]   ;;  %v2939_v4 = vld [vmem:[#allocation6 + $0x20c] ss:$16 sps:$4 sm:$0xff]  }
  0x4f   :  { %1707 = vmatprep.subr.bf16.mxu0 %v2874_v24  ;;  %1879 = vmatprep.subr.bf16.mxu1 %v2876_v25  ;;  %v2934_v6 = vld [vmem:[#allocation6 + $0x200] ss:$16 sps:$4 sm:$0xff]   ;;  %v2937_v7 = vld [vmem:[#allocation6 + $0x208] ss:$16 sps:$4 sm:$0xff]   ;;  %v2942_v8 = vld [vmem:[#allocation6 + $0x224] ss:$16 sps:$4 sm:$0xff]  }
  0x50   :  { %v2945_v9 = vld [vmem:[#allocation6 + $0x22c] ss:$16 sps:$4 sm:$0xff]   ;;  %v2940_v10 = vld [vmem:[#allocation6 + $0x220] ss:$16 sps:$4 sm:$0xff]   ;;  %v2943_v11 = vld [vmem:[#allocation6 + $0x228] ss:$16 sps:$4 sm:$0xff]  }
  0x51   :  { %v2948_v12 = vld [vmem:[#allocation6 + $0x244] ss:$16 sps:$4 sm:$0xff]   ;;  %v2951_v13 = vld [vmem:[#allocation6 + $0x24c] ss:$16 sps:$4 sm:$0xff]   ;;  %v2946_v14 = vld [vmem:[#allocation6 + $0x240] ss:$16 sps:$4 sm:$0xff]  }
  0x52   :  { %1708 = vmatpush1.bf16.msra.mxu0 %v2878_v26  ;;  %1880 = vmatpush1.bf16.msra.mxu1 %v2879_v27  ;;  %v2949_v15 = vld [vmem:[#allocation6 + $0x248] ss:$16 sps:$4 sm:$0xff]   ;;  %v2954_v16 = vld [vmem:[#allocation6 + $0x264] ss:$16 sps:$4 sm:$0xff]   ;;  %v2957_v17 = vld [vmem:[#allocation6 + $0x26c] ss:$16 sps:$4 sm:$0xff]  }
  0x53   :  { %1709 = vmatprep.subr.bf16.mxu0 %v2880_v28  ;;  %1881 = vmatprep.subr.bf16.mxu1 %v2882_v29  ;;  %v2952_v18 = vld [vmem:[#allocation6 + $0x260] ss:$16 sps:$4 sm:$0xff]   ;;  %v2955_v19 = vld [vmem:[#allocation6 + $0x268] ss:$16 sps:$4 sm:$0xff]   ;;  %v2960_v20 = vld [vmem:[#allocation6 + $0x284] ss:$16 sps:$4 sm:$0xff]  }
  0x54   :  { %v2963_v21 = vld [vmem:[#allocation6 + $0x28c] ss:$16 sps:$4 sm:$0xff]   ;;  %v2958_v22 = vld [vmem:[#allocation6 + $0x280] ss:$16 sps:$4 sm:$0xff]   ;;  %v2961_v23 = vld [vmem:[#allocation6 + $0x288] ss:$16 sps:$4 sm:$0xff]  }
  0x55   :  { %v2966_v24 = vld [vmem:[#allocation6 + $0x2a4] ss:$16 sps:$4 sm:$0xff]   ;;  %v2969_v25 = vld [vmem:[#allocation6 + $0x2ac] ss:$16 sps:$4 sm:$0xff]   ;;  %v2964_v26 = vld [vmem:[#allocation6 + $0x2a0] ss:$16 sps:$4 sm:$0xff]  }
  0x56   :  { %1710 = vmatpush1.bf16.msra.mxu0 %v2884_v30  ;;  %1882 = vmatpush1.bf16.msra.mxu1 %v2885_v31  ;;  %v2967_v27 = vld [vmem:[#allocation6 + $0x2a8] ss:$16 sps:$4 sm:$0xff]   ;;  %v2972_v28 = vld [vmem:[#allocation6 + $0x2c4] ss:$16 sps:$4 sm:$0xff]   ;;  %v2975_v29 = vld [vmem:[#allocation6 + $0x2cc] ss:$16 sps:$4 sm:$0xff]  }
  0x57   :  { %1711 = vmatprep.subr.bf16.mxu0 %v2886_v32  ;;  %1883 = vmatprep.subr.bf16.mxu1 %v2888_v33  ;;  %v3426_v30 = vld [vmem:[#allocation3 + $0x8] sm:$0xff]  ;;  %v2970_v32 = vld [vmem:[#allocation6 + $0x2c0] ss:$16 sps:$4 sm:$0xff]   ;;  %v2996_v47 = vld [vmem:[#allocation6 + $0x344] ss:$16 sps:$4 sm:$0xff]  }
  0x58   :  { %v3428_v31 = vld [vmem:[#allocation3 + $0x28] sm:$0xff] }
  0x59   :  { %v2973_v33 = vld [vmem:[#allocation6 + $0x2c8] ss:$16 sps:$4 sm:$0xff]  }
  0x5a   :  { %1712 = vmatpush1.bf16.msra.mxu0 %v2890_v34  ;;  %1884 = vmatpush1.bf16.msra.mxu1 %v2891_v35  ;;  %v2464_v34 = vcombine.high %v3426_v30, %v3428_v31  ;;  %v2978_v35 = vld [vmem:[#allocation6 + $0x2e4] ss:$16 sps:$4 sm:$0xff]   ;;  %v2991_v46 = vld [vmem:[#allocation6 + $0x328] ss:$16 sps:$4 sm:$0xff]  }
  0x5b   :  { %1713 = vmatprep.subr.bf16.mxu0 %v2892_v36  ;;  %1885 = vmatprep.subr.bf16.mxu1 %v2894_v37  ;;  %v2981_v36 = vld [vmem:[#allocation6 + $0x2ec] ss:$16 sps:$4 sm:$0xff]   ;;  %v2976_v37 = vld [vmem:[#allocation6 + $0x2e0] ss:$16 sps:$4 sm:$0xff]   ;;  %v2997_v50 = vld [vmem:[#allocation6 + $0x348] ss:$16 sps:$4 sm:$0xff]  }
  0x5e   :  { %1714 = vmatpush1.bf16.msra.mxu0 %v2896_v38  ;;  %1886 = vmatpush1.bf16.msra.mxu1 %v2897_v39  ;;  %v2979_v38 = vld [vmem:[#allocation6 + $0x2e8] ss:$16 sps:$4 sm:$0xff]   ;;  %v2984_v39 = vld [vmem:[#allocation6 + $0x304] ss:$16 sps:$4 sm:$0xff]  }
  0x5f   :  { %1715 = vmatprep.subr.bf16.mxu0 %v2898_v40  ;;  %1887 = vmatprep.subr.bf16.mxu1 %v2900_v41  ;;  %v2987_v40 = vld [vmem:[#allocation6 + $0x30c] ss:$16 sps:$4 sm:$0xff]   ;;  %v2982_v41 = vld [vmem:[#allocation6 + $0x300] ss:$16 sps:$4 sm:$0xff]  }
  0x62   :  { %1716 = vmatpush1.bf16.msra.mxu0 %v2902_v42  ;;  %1888 = vmatpush1.bf16.msra.mxu1 %v2903_v43  ;;  %v2985_v42 = vld [vmem:[#allocation6 + $0x308] ss:$16 sps:$4 sm:$0xff]   ;;  %v2990_v43 = vld [vmem:[#allocation6 + $0x324] ss:$16 sps:$4 sm:$0xff]  }
  0x63   :  { %1717 = vmatprep.subr.bf16.mxu0 %v2904_v44  ;;  %1889 = vmatprep.subr.bf16.mxu1 %v2906_v45  ;;  %v2993_v44 = vld [vmem:[#allocation6 + $0x32c] ss:$16 sps:$4 sm:$0xff]   ;;  %v2988_v45 = vld [vmem:[#allocation6 + $0x320] ss:$16 sps:$4 sm:$0xff]  }
  0x66   :  { %1718 = vmatpush1.bf16.msra.mxu0 %v2908_v48  ;;  %1890 = vmatpush1.bf16.msra.mxu1 %v2909_v49  ;;  %v2999_v48 = vld [vmem:[#allocation6 + $0x34c] ss:$16 sps:$4 sm:$0xff]   ;;  %v2994_v49 = vld [vmem:[#allocation6 + $0x340] ss:$16 sps:$4 sm:$0xff]  }
  0x67   :  { %1719 = vmatprep.subr.bf16.mxu0 %v2910_v51  ;;  %1891 = vmatprep.subr.bf16.mxu1 %v2912_v52  ;;  %v3002_v51 = vld [vmem:[#allocation6 + $0x364] ss:$16 sps:$4 sm:$0xff]   ;;  %v3005_v52 = vld [vmem:[#allocation6 + $0x36c] ss:$16 sps:$4 sm:$0xff]  }
  0x6a   :  { %1720 = vmatpush1.bf16.msra.mxu0 %v2914_v53  ;;  %1892 = vmatpush1.bf16.msra.mxu1 %v2915_v54  ;;  %v3000_v53 = vld [vmem:[#allocation6 + $0x360] ss:$16 sps:$4 sm:$0xff]   ;;  %v3003_v54 = vld [vmem:[#allocation6 + $0x368] ss:$16 sps:$4 sm:$0xff]  }
  0x6b   :  { %1721 = vmatprep.subr.bf16.mxu0 %v2916_v55  ;;  %1893 = vmatprep.subr.bf16.mxu1 %v2918_v56  ;;  %v3008_v55 = vld [vmem:[#allocation6 + $0x384] ss:$16 sps:$4 sm:$0xff]   ;;  %v3011_v56 = vld [vmem:[#allocation6 + $0x38c] ss:$16 sps:$4 sm:$0xff]  }
  0x6e   :  { %1722 = vmatpush1.bf16.msra.mxu0 %v2920_v57  ;;  %1894 = vmatpush1.bf16.msra.mxu1 %v2921_v58  ;;  %v3006_v57 = vld [vmem:[#allocation6 + $0x380] ss:$16 sps:$4 sm:$0xff]   ;;  %v3009_v58 = vld [vmem:[#allocation6 + $0x388] ss:$16 sps:$4 sm:$0xff]  }
  0x6f   :  { %1723 = vmatprep.subr.bf16.mxu0 %v2922_v59  ;;  %1895 = vmatprep.subr.bf16.mxu1 %v2924_v60  ;;  %v3014_v59 = vld [vmem:[#allocation6 + $0x3a4] ss:$16 sps:$4 sm:$0xff]   ;;  %v3017_v60 = vld [vmem:[#allocation6 + $0x3ac] ss:$16 sps:$4 sm:$0xff]  }
  0x72   :  { %1724 = vmatpush1.bf16.msra.mxu0 %v2926_v61  ;;  %1896 = vmatpush1.bf16.msra.mxu1 %v2927_v62  ;;  %v3012_v61 = vld [vmem:[#allocation6 + $0x3a0] ss:$16 sps:$4 sm:$0xff]   ;;  %v3015_v62 = vld [vmem:[#allocation6 + $0x3a8] ss:$16 sps:$4 sm:$0xff]  }
  0x73   :  { %1725 = vmatprep.subr.bf16.mxu0 %v2928_v63  ;;  %1897 = vmatprep.subr.bf16.mxu1 %v2930_v0  ;;  %v3020_v63 = vld [vmem:[#allocation6 + $0x3c4] ss:$16 sps:$4 sm:$0xff]   ;;  %v3023_v0 = vld [vmem:[#allocation6 + $0x3cc] ss:$16 sps:$4 sm:$0xff]  }
  0x76   :  { %1726 = vmatpush1.bf16.msra.mxu0 %v2932_v1  ;;  %1898 = vmatpush1.bf16.msra.mxu1 %v2933_v2  ;;  %v3018_v1 = vld [vmem:[#allocation6 + $0x3c0] ss:$16 sps:$4 sm:$0xff]   ;;  %v3021_v2 = vld [vmem:[#allocation6 + $0x3c8] ss:$16 sps:$4 sm:$0xff]  }
  0x77   :  { %1738 = vmatprep.subr.bf16.mxu0 %v2936_v3  ;;  %1910 = vmatprep.subr.bf16.mxu1 %v2939_v4  ;;  %v3026_v3 = vld [vmem:[#allocation6 + $0x3e4] ss:$16 sps:$4 sm:$0xff]   ;;  %v3029_v4 = vld [vmem:[#allocation6 + $0x3ec] ss:$16 sps:$4 sm:$0xff]  }
  0x79   :  { %1728 = vmatmul.mubr.bf16.vlgmr.msra.gmra.mrb[0].mxu0 %v2461_v5  ;;  %1900 = vmatmul.mubr.bf16.vlgmr.msra.gmra.mrb[0].mxu1 %v2461_v5  ;;  %v3024_v5 = vld [vmem:[#allocation6 + $0x3e0] ss:$16 sps:$4 sm:$0xff]  }
  0x7a   :  { %1739 = vmatpush1.bf16.msra.mxu0 %v2934_v6  ;;  %1911 = vmatpush1.bf16.msra.mxu1 %v2937_v7  ;;  %v3027_v6 = vld [vmem:[#allocation6 + $0x3e8] ss:$16 sps:$4 sm:$0xff]   ;;  %v3032_v7 = vld [vmem:[#allocation6 + $0x404] ss:$16 sps:$4 sm:$0xff]  }
  0x7b   :  { %1740 = vmatprep.subr.bf16.mxu0 %v2942_v8  ;;  %1912 = vmatprep.subr.bf16.mxu1 %v2945_v9  ;;  %v3035_v8 = vld [vmem:[#allocation6 + $0x40c] ss:$16 sps:$4 sm:$0xff]   ;;  %v2463_v9 = vcombine.low %v3426_v30, %v3428_v31  ;;  %v3057_v30 = vld [vmem:[#allocation6 + $0x488] ss:$16 sps:$4 sm:$0xff]   ;;  %v3062_v31 = vld [vmem:[#allocation6 + $0x4a4] ss:$16 sps:$4 sm:$0xff]  }
  0x7c   :  { %1770 = vmatprep.mubr.bf16.mxu0 %v2464_v34  ;;  %1942 = vmatprep.mubr.bf16.mxu1 %v2464_v34  ;;  %v3063_v34 = vld [vmem:[#allocation6 + $0x4a8] ss:$16 sps:$4 sm:$0xff]  }
  0x7e   :  { %1741 = vmatpush1.bf16.msra.mxu0 %v2940_v10  ;;  %1913 = vmatpush1.bf16.msra.mxu1 %v2943_v11  ;;  %v3030_v10 = vld [vmem:[#allocation6 + $0x400] ss:$16 sps:$4 sm:$0xff]   ;;  %v3033_v11 = vld [vmem:[#allocation6 + $0x408] ss:$16 sps:$4 sm:$0xff]  }
  0x7f   :  { %1742 = vmatprep.subr.bf16.mxu0 %v2948_v12  ;;  %1914 = vmatprep.subr.bf16.mxu1 %v2951_v13  ;;  %v3038_v12 = vld [vmem:[#allocation6 + $0x424] ss:$16 sps:$4 sm:$0xff]   ;;  %v3041_v13 = vld [vmem:[#allocation6 + $0x42c] ss:$16 sps:$4 sm:$0xff]  }
  0x82   :  { %1743 = vmatpush1.bf16.msra.mxu0 %v2946_v14  ;;  %1915 = vmatpush1.bf16.msra.mxu1 %v2949_v15  ;;  %v3434_v14 = vld [vmem:[#allocation3 + $0x10] sm:$0xff] }
  0x83   :  { %1744 = vmatprep.subr.bf16.mxu0 %v2954_v16  ;;  %1916 = vmatprep.subr.bf16.mxu1 %v2957_v17  ;;  %v3436_v15 = vld [vmem:[#allocation3 + $0x30] sm:$0xff] }
  0x84   :  { %v2466_v16 = vcombine.high %v3434_v14, %v3436_v15  ;;  %v3036_v17 = vld [vmem:[#allocation6 + $0x420] ss:$16 sps:$4 sm:$0xff]  }
  0x86   :  { %1745 = vmatpush1.bf16.msra.mxu0 %v2952_v18  ;;  %1917 = vmatpush1.bf16.msra.mxu1 %v2955_v19  ;;  %v3039_v18 = vld [vmem:[#allocation6 + $0x428] ss:$16 sps:$4 sm:$0xff]   ;;  %v3044_v19 = vld [vmem:[#allocation6 + $0x444] ss:$16 sps:$4 sm:$0xff]  }
  0x87   :  { %1746 = vmatprep.subr.bf16.mxu0 %v2960_v20  ;;  %1918 = vmatprep.subr.bf16.mxu1 %v2963_v21  ;;  %v3047_v20 = vld [vmem:[#allocation6 + $0x44c] ss:$16 sps:$4 sm:$0xff]   ;;  %v3042_v21 = vld [vmem:[#allocation6 + $0x440] ss:$16 sps:$4 sm:$0xff]  }
  0x8a   :  { %1747 = vmatpush1.bf16.msra.mxu0 %v2958_v22  ;;  %1919 = vmatpush1.bf16.msra.mxu1 %v2961_v23  ;;  %v3045_v22 = vld [vmem:[#allocation6 + $0x448] ss:$16 sps:$4 sm:$0xff]   ;;  %v3050_v23 = vld [vmem:[#allocation6 + $0x464] ss:$16 sps:$4 sm:$0xff]  }
  0x8b   :  { %1748 = vmatprep.subr.bf16.mxu0 %v2966_v24  ;;  %1920 = vmatprep.subr.bf16.mxu1 %v2969_v25  ;;  %v3053_v24 = vld [vmem:[#allocation6 + $0x46c] ss:$16 sps:$4 sm:$0xff]   ;;  %v3048_v25 = vld [vmem:[#allocation6 + $0x460] ss:$16 sps:$4 sm:$0xff]  }
  0x8e   :  { %1749 = vmatpush1.bf16.msra.mxu0 %v2964_v26  ;;  %1921 = vmatpush1.bf16.msra.mxu1 %v2967_v27  ;;  %v3051_v26 = vld [vmem:[#allocation6 + $0x468] ss:$16 sps:$4 sm:$0xff]   ;;  %v3056_v27 = vld [vmem:[#allocation6 + $0x484] ss:$16 sps:$4 sm:$0xff]  }
  0x8f   :  { %1750 = vmatprep.subr.bf16.mxu0 %v2972_v28  ;;  %1922 = vmatprep.subr.bf16.mxu1 %v2975_v29  ;;  %v3059_v28 = vld [vmem:[#allocation6 + $0x48c] ss:$16 sps:$4 sm:$0xff]   ;;  %v3054_v29 = vld [vmem:[#allocation6 + $0x480] ss:$16 sps:$4 sm:$0xff]  }
  0x92   :  { %1751 = vmatpush1.bf16.msra.mxu0 %v2970_v32  ;;  %1923 = vmatpush1.bf16.msra.mxu1 %v2973_v33  ;;  %v3065_v32 = vld [vmem:[#allocation6 + $0x4ac] ss:$16 sps:$4 sm:$0xff]   ;;  %v3060_v33 = vld [vmem:[#allocation6 + $0x4a0] ss:$16 sps:$4 sm:$0xff]  }
  0x93   :  { %1752 = vmatprep.subr.bf16.mxu0 %v2978_v35  ;;  %1924 = vmatprep.subr.bf16.mxu1 %v2981_v36  ;;  %v3068_v35 = vld [vmem:[#allocation6 + $0x4c4] ss:$16 sps:$4 sm:$0xff]   ;;  %v3071_v36 = vld [vmem:[#allocation6 + $0x4cc] ss:$16 sps:$4 sm:$0xff]  }
  0x96   :  { %1753 = vmatpush1.bf16.msra.mxu0 %v2976_v37  ;;  %1925 = vmatpush1.bf16.msra.mxu1 %v2979_v38  ;;  %v3066_v37 = vld [vmem:[#allocation6 + $0x4c0] ss:$16 sps:$4 sm:$0xff]   ;;  %v3069_v38 = vld [vmem:[#allocation6 + $0x4c8] ss:$16 sps:$4 sm:$0xff]  }
  0x97   :  { %1754 = vmatprep.subr.bf16.mxu0 %v2984_v39  ;;  %1926 = vmatprep.subr.bf16.mxu1 %v2987_v40  ;;  %v3074_v39 = vld [vmem:[#allocation6 + $0x4e4] ss:$16 sps:$4 sm:$0xff]   ;;  %v3077_v40 = vld [vmem:[#allocation6 + $0x4ec] ss:$16 sps:$4 sm:$0xff]  }
  0x9a   :  { %1755 = vmatpush1.bf16.msra.mxu0 %v2982_v41  ;;  %1927 = vmatpush1.bf16.msra.mxu1 %v2985_v42  ;;  %v3072_v41 = vld [vmem:[#allocation6 + $0x4e0] ss:$16 sps:$4 sm:$0xff]   ;;  %v3075_v42 = vld [vmem:[#allocation6 + $0x4e8] ss:$16 sps:$4 sm:$0xff]  }
  0x9b   :  { %1756 = vmatprep.subr.bf16.mxu0 %v2990_v43  ;;  %1928 = vmatprep.subr.bf16.mxu1 %v2993_v44  ;;  %v3080_v43 = vld [vmem:[#allocation6 + $0x504] ss:$16 sps:$4 sm:$0xff]   ;;  %v3083_v44 = vld [vmem:[#allocation6 + $0x50c] ss:$16 sps:$4 sm:$0xff]  }
  0x9e   :  { %1757 = vmatpush1.bf16.msra.mxu0 %v2988_v45  ;;  %1929 = vmatpush1.bf16.msra.mxu1 %v2991_v46  ;;  %v3078_v45 = vld [vmem:[#allocation6 + $0x500] ss:$16 sps:$4 sm:$0xff]   ;;  %v3081_v46 = vld [vmem:[#allocation6 + $0x508] ss:$16 sps:$4 sm:$0xff]  }
  0x9f   :  { %1758 = vmatprep.subr.bf16.mxu0 %v2996_v47  ;;  %1930 = vmatprep.subr.bf16.mxu1 %v2999_v48  ;;  %v3086_v47 = vld [vmem:[#allocation6 + $0x524] ss:$16 sps:$4 sm:$0xff]   ;;  %v3089_v48 = vld [vmem:[#allocation6 + $0x52c] ss:$16 sps:$4 sm:$0xff]  }
  0xa2   :  { %1759 = vmatpush1.bf16.msra.mxu0 %v2994_v49  ;;  %1931 = vmatpush1.bf16.msra.mxu1 %v2997_v50  ;;  %v3084_v49 = vld [vmem:[#allocation6 + $0x520] ss:$16 sps:$4 sm:$0xff]   ;;  %v3087_v50 = vld [vmem:[#allocation6 + $0x528] ss:$16 sps:$4 sm:$0xff]  }
  0xa3   :  { %1760 = vmatprep.subr.bf16.mxu0 %v3002_v51  ;;  %1932 = vmatprep.subr.bf16.mxu1 %v3005_v52  ;;  %v3092_v51 = vld [vmem:[#allocation6 + $0x544] ss:$16 sps:$4 sm:$0xff]   ;;  %v3095_v52 = vld [vmem:[#allocation6 + $0x54c] ss:$16 sps:$4 sm:$0xff]  }
  0xa6   :  { %1761 = vmatpush1.bf16.msra.mxu0 %v3000_v53  ;;  %1933 = vmatpush1.bf16.msra.mxu1 %v3003_v54  ;;  %v3090_v53 = vld [vmem:[#allocation6 + $0x540] ss:$16 sps:$4 sm:$0xff]   ;;  %v3093_v54 = vld [vmem:[#allocation6 + $0x548] ss:$16 sps:$4 sm:$0xff]  }
  0xa7   :  { %1762 = vmatprep.subr.bf16.mxu0 %v3008_v55  ;;  %1934 = vmatprep.subr.bf16.mxu1 %v3011_v56  ;;  %v3098_v55 = vld [vmem:[#allocation6 + $0x564] ss:$16 sps:$4 sm:$0xff]   ;;  %v3101_v56 = vld [vmem:[#allocation6 + $0x56c] ss:$16 sps:$4 sm:$0xff]  }
  0xaa   :  { %1763 = vmatpush1.bf16.msra.mxu0 %v3006_v57  ;;  %1935 = vmatpush1.bf16.msra.mxu1 %v3009_v58  ;;  %v3096_v57 = vld [vmem:[#allocation6 + $0x560] ss:$16 sps:$4 sm:$0xff]   ;;  %v3099_v58 = vld [vmem:[#allocation6 + $0x568] ss:$16 sps:$4 sm:$0xff]  }
  0xab   :  { %1764 = vmatprep.subr.bf16.mxu0 %v3014_v59  ;;  %1936 = vmatprep.subr.bf16.mxu1 %v3017_v60  ;;  %v3104_v59 = vld [vmem:[#allocation6 + $0x584] ss:$16 sps:$4 sm:$0xff]   ;;  %v3107_v60 = vld [vmem:[#allocation6 + $0x58c] ss:$16 sps:$4 sm:$0xff]  }
  0xae   :  { %1765 = vmatpush1.bf16.msra.mxu0 %v3012_v61  ;;  %1937 = vmatpush1.bf16.msra.mxu1 %v3015_v62  ;;  %v3102_v61 = vld [vmem:[#allocation6 + $0x580] ss:$16 sps:$4 sm:$0xff]   ;;  %v3105_v62 = vld [vmem:[#allocation6 + $0x588] ss:$16 sps:$4 sm:$0xff]  }
  0xaf   :  { %1766 = vmatprep.subr.bf16.mxu0 %v3020_v63  ;;  %1938 = vmatprep.subr.bf16.mxu1 %v3023_v0  ;;  %v3110_v63 = vld [vmem:[#allocation6 + $0x5a4] ss:$16 sps:$4 sm:$0xff]   ;;  %v3113_v0 = vld [vmem:[#allocation6 + $0x5ac] ss:$16 sps:$4 sm:$0xff]  }
  0xb2   :  { %1767 = vmatpush1.bf16.msra.mxu0 %v3018_v1  ;;  %1939 = vmatpush1.bf16.msra.mxu1 %v3021_v2  ;;  %v3108_v1 = vld [vmem:[#allocation6 + $0x5a0] ss:$16 sps:$4 sm:$0xff]   ;;  %v3111_v2 = vld [vmem:[#allocation6 + $0x5a8] ss:$16 sps:$4 sm:$0xff]  }
  0xb3   :  { %1768 = vmatprep.subr.bf16.mxu0 %v3026_v3  ;;  %1940 = vmatprep.subr.bf16.mxu1 %v3029_v4  ;;  %v3116_v3 = vld [vmem:[#allocation6 + $0x5c4] ss:$16 sps:$4 sm:$0xff]   ;;  %v3119_v4 = vld [vmem:[#allocation6 + $0x5cc] ss:$16 sps:$4 sm:$0xff]  }
  0xb6   :  { %1769 = vmatpush1.bf16.msra.mxu0 %v3024_v5  ;;  %1941 = vmatpush1.bf16.msra.mxu1 %v3027_v6  ;;  %v3114_v5 = vld [vmem:[#allocation6 + $0x5c0] ss:$16 sps:$4 sm:$0xff]   ;;  %v3117_v6 = vld [vmem:[#allocation6 + $0x5c8] ss:$16 sps:$4 sm:$0xff]  }
  0xb7   :  { %1781 = vmatprep.subr.bf16.mxu0 %v3032_v7  ;;  %1953 = vmatprep.subr.bf16.mxu1 %v3035_v8  ;;  %v3122_v7 = vld [vmem:[#allocation6 + $0x5e4] ss:$16 sps:$4 sm:$0xff]   ;;  %v3125_v8 = vld [vmem:[#allocation6 + $0x5ec] ss:$16 sps:$4 sm:$0xff]  }
  0xb9   :  { %1771 = vmatmul.mubr.bf16.vlgmr.msra.gmra.mrb[0].mxu0 %v2463_v9  ;;  %1943 = vmatmul.mubr.bf16.vlgmr.msra.gmra.mrb[0].mxu1 %v2463_v9  ;;  %v3120_v9 = vld [vmem:[#allocation6 + $0x5e0] ss:$16 sps:$4 sm:$0xff]  }
  0xba   :  { %1782 = vmatpush1.bf16.msra.mxu0 %v3030_v10  ;;  %1954 = vmatpush1.bf16.msra.mxu1 %v3033_v11  ;;  %v3123_v10 = vld [vmem:[#allocation6 + $0x5e8] ss:$16 sps:$4 sm:$0xff]   ;;  %v3128_v11 = vld [vmem:[#allocation6 + $0x604] ss:$16 sps:$4 sm:$0xff]  }
  0xbb   :  { %1783 = vmatprep.subr.bf16.mxu0 %v3038_v12  ;;  %1955 = vmatprep.subr.bf16.mxu1 %v3041_v13  ;;  %v3131_v12 = vld [vmem:[#allocation6 + $0x60c] ss:$16 sps:$4 sm:$0xff]   ;;  %v3126_v13 = vld [vmem:[#allocation6 + $0x600] ss:$16 sps:$4 sm:$0xff]  }
  0xbc   :  { %1813 = vmatprep.mubr.bf16.mxu0 %v2466_v16  ;;  %1985 = vmatprep.mubr.bf16.mxu1 %v2466_v16  ;;  %v3129_v16 = vld [vmem:[#allocation6 + $0x608] ss:$16 sps:$4 sm:$0xff]  }
  0xbe   :  { %1784 = vmatpush1.bf16.msra.mxu0 %v3036_v17  ;;  %1956 = vmatpush1.bf16.msra.mxu1 %v3039_v18  ;;  %v3440_v17 = vld [vmem:[#allocation3 + $0x18] sm:$0xff]  ;;  %v2465_v18 = vcombine.low %v3434_v14, %v3436_v15  ;;  %v3138_v14 = vld [vmem:[#allocation6 + $0x640] ss:$16 sps:$4 sm:$0xff]  }
  0xbf   :  { %1785 = vmatprep.subr.bf16.mxu0 %v3044_v19  ;;  %1957 = vmatprep.subr.bf16.mxu1 %v3047_v20  ;;  %v3444_v19 = vld [vmem:[#allocation3 + $0x38] sm:$0xff]  ;;  %v3134_v20 = vld [vmem:[#allocation6 + $0x624] ss:$16 sps:$4 sm:$0xff]  }
  0xc0   :  { %v3141_v15 = vld [vmem:[#allocation6 + $0x648] ss:$16 sps:$4 sm:$0xff]  }
  0xc2   :  { %1786 = vmatpush1.bf16.msra.mxu0 %v3042_v21  ;;  %1958 = vmatpush1.bf16.msra.mxu1 %v3045_v22  ;;  %v3137_v21 = vld [vmem:[#allocation6 + $0x62c] ss:$16 sps:$4 sm:$0xff]   ;;  %v3132_v22 = vld [vmem:[#allocation6 + $0x620] ss:$16 sps:$4 sm:$0xff]  }
  0xc3   :  { %1787 = vmatprep.subr.bf16.mxu0 %v3050_v23  ;;  %1959 = vmatprep.subr.bf16.mxu1 %v3053_v24  ;;  %v3135_v23 = vld [vmem:[#allocation6 + $0x628] ss:$16 sps:$4 sm:$0xff]   ;;  %v2468_v24 = vcombine.high %v3440_v17, %v3444_v19 }
  0xc6   :  { %1788 = vmatpush1.bf16.msra.mxu0 %v3048_v25  ;;  %1960 = vmatpush1.bf16.msra.mxu1 %v3051_v26  ;;  %v3140_v25 = vld [vmem:[#allocation6 + $0x644] ss:$16 sps:$4 sm:$0xff]   ;;  %v3143_v26 = vld [vmem:[#allocation6 + $0x64c] ss:$16 sps:$4 sm:$0xff]  }
  0xc7   :  { %1789 = vmatprep.subr.bf16.mxu0 %v3056_v27  ;;  %1961 = vmatprep.subr.bf16.mxu1 %v3059_v28  ;;  %v3146_v27 = vld [vmem:[#allocation6 + $0x664] ss:$16 sps:$4 sm:$0xff]   ;;  %v3149_v28 = vld [vmem:[#allocation6 + $0x66c] ss:$16 sps:$4 sm:$0xff]  }
  0xca   :  { %1790 = vmatpush1.bf16.msra.mxu0 %v3054_v29  ;;  %1962 = vmatpush1.bf16.msra.mxu1 %v3057_v30  ;;  %v3144_v29 = vld [vmem:[#allocation6 + $0x660] ss:$16 sps:$4 sm:$0xff]   ;;  %v3147_v30 = vld [vmem:[#allocation6 + $0x668] ss:$16 sps:$4 sm:$0xff]  }
  0xcb   :  { %1791 = vmatprep.subr.bf16.mxu0 %v3062_v31  ;;  %1963 = vmatprep.subr.bf16.mxu1 %v3065_v32  ;;  %v3152_v31 = vld [vmem:[#allocation6 + $0x684] ss:$16 sps:$4 sm:$0xff]   ;;  %v3155_v32 = vld [vmem:[#allocation6 + $0x68c] ss:$16 sps:$4 sm:$0xff]  }
  0xce   :  { %1792 = vmatpush1.bf16.msra.mxu0 %v3060_v33  ;;  %1964 = vmatpush1.bf16.msra.mxu1 %v3063_v34  ;;  %v3150_v33 = vld [vmem:[#allocation6 + $0x680] ss:$16 sps:$4 sm:$0xff]   ;;  %v3153_v34 = vld [vmem:[#allocation6 + $0x688] ss:$16 sps:$4 sm:$0xff]  }
  0xcf   :  { %1793 = vmatprep.subr.bf16.mxu0 %v3068_v35  ;;  %1965 = vmatprep.subr.bf16.mxu1 %v3071_v36  ;;  %v3158_v35 = vld [vmem:[#allocation6 + $0x6a4] ss:$16 sps:$4 sm:$0xff]   ;;  %v3161_v36 = vld [vmem:[#allocation6 + $0x6ac] ss:$16 sps:$4 sm:$0xff]  }
  0xd2   :  { %1794 = vmatpush1.bf16.msra.mxu0 %v3066_v37  ;;  %1966 = vmatpush1.bf16.msra.mxu1 %v3069_v38  ;;  %v3156_v37 = vld [vmem:[#allocation6 + $0x6a0] ss:$16 sps:$4 sm:$0xff]   ;;  %v3159_v38 = vld [vmem:[#allocation6 + $0x6a8] ss:$16 sps:$4 sm:$0xff]  }
  0xd3   :  { %1795 = vmatprep.subr.bf16.mxu0 %v3074_v39  ;;  %1967 = vmatprep.subr.bf16.mxu1 %v3077_v40  ;;  %v3164_v39 = vld [vmem:[#allocation6 + $0x6c4] ss:$16 sps:$4 sm:$0xff]   ;;  %v3167_v40 = vld [vmem:[#allocation6 + $0x6cc] ss:$16 sps:$4 sm:$0xff]  }
  0xd6   :  { %1796 = vmatpush1.bf16.msra.mxu0 %v3072_v41  ;;  %1968 = vmatpush1.bf16.msra.mxu1 %v3075_v42  ;;  %v3162_v41 = vld [vmem:[#allocation6 + $0x6c0] ss:$16 sps:$4 sm:$0xff]   ;;  %v3165_v42 = vld [vmem:[#allocation6 + $0x6c8] ss:$16 sps:$4 sm:$0xff]  }
  0xd7   :  { %1797 = vmatprep.subr.bf16.mxu0 %v3080_v43  ;;  %1969 = vmatprep.subr.bf16.mxu1 %v3083_v44  ;;  %v3170_v43 = vld [vmem:[#allocation6 + $0x6e4] ss:$16 sps:$4 sm:$0xff]   ;;  %v3173_v44 = vld [vmem:[#allocation6 + $0x6ec] ss:$16 sps:$4 sm:$0xff]  }
  0xda   :  { %1798 = vmatpush1.bf16.msra.mxu0 %v3078_v45  ;;  %1970 = vmatpush1.bf16.msra.mxu1 %v3081_v46  ;;  %v3168_v45 = vld [vmem:[#allocation6 + $0x6e0] ss:$16 sps:$4 sm:$0xff]   ;;  %v3171_v46 = vld [vmem:[#allocation6 + $0x6e8] ss:$16 sps:$4 sm:$0xff]  }
  0xdb   :  { %1799 = vmatprep.subr.bf16.mxu0 %v3086_v47  ;;  %1971 = vmatprep.subr.bf16.mxu1 %v3089_v48  ;;  %v3176_v47 = vld [vmem:[#allocation6 + $0x704] ss:$16 sps:$4 sm:$0xff]   ;;  %v3179_v48 = vld [vmem:[#allocation6 + $0x70c] ss:$16 sps:$4 sm:$0xff]  }
  0xde   :  { %1800 = vmatpush1.bf16.msra.mxu0 %v3084_v49  ;;  %1972 = vmatpush1.bf16.msra.mxu1 %v3087_v50  ;;  %v3174_v49 = vld [vmem:[#allocation6 + $0x700] ss:$16 sps:$4 sm:$0xff]   ;;  %v3177_v50 = vld [vmem:[#allocation6 + $0x708] ss:$16 sps:$4 sm:$0xff]  }
  0xdf   :  { %1801 = vmatprep.subr.bf16.mxu0 %v3092_v51  ;;  %1973 = vmatprep.subr.bf16.mxu1 %v3095_v52  ;;  %v3182_v51 = vld [vmem:[#allocation6 + $0x724] ss:$16 sps:$4 sm:$0xff]   ;;  %v3185_v52 = vld [vmem:[#allocation6 + $0x72c] ss:$16 sps:$4 sm:$0xff]  }
  0xe2   :  { %1802 = vmatpush1.bf16.msra.mxu0 %v3090_v53  ;;  %1974 = vmatpush1.bf16.msra.mxu1 %v3093_v54  ;;  %v3180_v53 = vld [vmem:[#allocation6 + $0x720] ss:$16 sps:$4 sm:$0xff]   ;;  %v3183_v54 = vld [vmem:[#allocation6 + $0x728] ss:$16 sps:$4 sm:$0xff]  }
  0xe3   :  { %1803 = vmatprep.subr.bf16.mxu0 %v3098_v55  ;;  %1975 = vmatprep.subr.bf16.mxu1 %v3101_v56  ;;  %v3188_v55 = vld [vmem:[#allocation6 + $0x744] ss:$16 sps:$4 sm:$0xff]   ;;  %v3191_v56 = vld [vmem:[#allocation6 + $0x74c] ss:$16 sps:$4 sm:$0xff]  }
  0xe6   :  { %1804 = vmatpush1.bf16.msra.mxu0 %v3096_v57  ;;  %1976 = vmatpush1.bf16.msra.mxu1 %v3099_v58  ;;  %v3186_v57 = vld [vmem:[#allocation6 + $0x740] ss:$16 sps:$4 sm:$0xff]   ;;  %v3189_v58 = vld [vmem:[#allocation6 + $0x748] ss:$16 sps:$4 sm:$0xff]  }
  0xe7   :  { %1805 = vmatprep.subr.bf16.mxu0 %v3104_v59  ;;  %1977 = vmatprep.subr.bf16.mxu1 %v3107_v60  ;;  %v3194_v59 = vld [vmem:[#allocation6 + $0x764] ss:$16 sps:$4 sm:$0xff]   ;;  %v3197_v60 = vld [vmem:[#allocation6 + $0x76c] ss:$16 sps:$4 sm:$0xff]  }
  0xea   :  { %1806 = vmatpush1.bf16.msra.mxu0 %v3102_v61  ;;  %1978 = vmatpush1.bf16.msra.mxu1 %v3105_v62  ;;  %v3192_v61 = vld [vmem:[#allocation6 + $0x760] ss:$16 sps:$4 sm:$0xff]   ;;  %v3195_v62 = vld [vmem:[#allocation6 + $0x768] ss:$16 sps:$4 sm:$0xff]  }
  0xeb   :  { %1807 = vmatprep.subr.bf16.mxu0 %v3110_v63  ;;  %1979 = vmatprep.subr.bf16.mxu1 %v3113_v0  ;;  %v3200_v63 = vld [vmem:[#allocation6 + $0x784] ss:$16 sps:$4 sm:$0xff]   ;;  %v3203_v0 = vld [vmem:[#allocation6 + $0x78c] ss:$16 sps:$4 sm:$0xff]  }
  0xee   :  { %1808 = vmatpush1.bf16.msra.mxu0 %v3108_v1  ;;  %1980 = vmatpush1.bf16.msra.mxu1 %v3111_v2  ;;  %v3198_v1 = vld [vmem:[#allocation6 + $0x780] ss:$16 sps:$4 sm:$0xff]   ;;  %v3201_v2 = vld [vmem:[#allocation6 + $0x788] ss:$16 sps:$4 sm:$0xff]  }
  0xef   :  { %1809 = vmatprep.subr.bf16.mxu0 %v3116_v3  ;;  %1981 = vmatprep.subr.bf16.mxu1 %v3119_v4  ;;  %v3206_v3 = vld [vmem:[#allocation6 + $0x7a4] ss:$16 sps:$4 sm:$0xff]   ;;  %v3209_v4 = vld [vmem:[#allocation6 + $0x7ac] ss:$16 sps:$4 sm:$0xff]  }
  0xf2   :  { %1810 = vmatpush1.bf16.msra.mxu0 %v3114_v5  ;;  %1982 = vmatpush1.bf16.msra.mxu1 %v3117_v6  ;;  %v3204_v5 = vld [vmem:[#allocation6 + $0x7a0] ss:$16 sps:$4 sm:$0xff]   ;;  %v3207_v6 = vld [vmem:[#allocation6 + $0x7a8] ss:$16 sps:$4 sm:$0xff]  }
  0xf3   :  { %1811 = vmatprep.subr.bf16.mxu0 %v3122_v7  ;;  %1983 = vmatprep.subr.bf16.mxu1 %v3125_v8  ;;  %v3212_v7 = vld [vmem:[#allocation6 + $0x7c4] ss:$16 sps:$4 sm:$0xff]   ;;  %v3215_v8 = vld [vmem:[#allocation6 + $0x7cc] ss:$16 sps:$4 sm:$0xff]  }
  0xf6   :  { %1812 = vmatpush1.bf16.msra.mxu0 %v3120_v9  ;;  %1984 = vmatpush1.bf16.msra.mxu1 %v3123_v10  ;;  %v3210_v9 = vld [vmem:[#allocation6 + $0x7c0] ss:$16 sps:$4 sm:$0xff]   ;;  %v3213_v10 = vld [vmem:[#allocation6 + $0x7c8] ss:$16 sps:$4 sm:$0xff]  }
  0xf7   :  { %1824 = vmatprep.subr.bf16.mxu0 %v3128_v11  ;;  %1996 = vmatprep.subr.bf16.mxu1 %v3131_v12  ;;  %v3218_v11 = vld [vmem:[#allocation6 + $0x7e4] ss:$16 sps:$4 sm:$0xff]   ;;  %v3221_v12 = vld [vmem:[#allocation6 + $0x7ec] ss:$16 sps:$4 sm:$0xff]  }
  0xf9   :  { %1814 = vmatmul.mubr.bf16.vlgmr.msra.gmra.mrb[0].mxu0 %v2465_v18  ;;  %1986 = vmatmul.mubr.bf16.vlgmr.msra.gmra.mrb[0].mxu1 %v2465_v18  ;;  %v3222_v18 = vld [vmem:[#allocation8 + $0x40] sm:$0xff]  }
  0xfa   :  { %1825 = vmatpush1.bf16.msra.mxu0 %v3126_v13  ;;  %1997 = vmatpush1.bf16.msra.mxu1 %v3129_v16  ;;  %v3216_v13 = vld [vmem:[#allocation6 + $0x7e0] ss:$16 sps:$4 sm:$0xff]   ;;  %v3219_v16 = vld [vmem:[#allocation6 + $0x7e8] ss:$16 sps:$4 sm:$0xff]  }
  0xfb   :  { %1826 = vmatprep.subr.bf16.mxu0 %v3134_v20  ;;  %1998 = vmatprep.subr.bf16.mxu1 %v3137_v21  ;;  %v3223_v20 = vld [vmem:[#allocation8 + $0xc0] sm:$0xff]   ;;  %v2467_v21 = vcombine.low %v3440_v17, %v3444_v19  ;;  %v3232_v17 = vld [vmem:[#allocation8 + $0x10] sm:$0xff]  }
  0xfc   :  { %1856 = vmatprep.mubr.bf16.mxu0 %v2468_v24  ;;  %2028 = vmatprep.mubr.bf16.mxu1 %v2468_v24  ;;  %v3226_v24 = vld [vmem:[#allocation8 + $0x48] sm:$0xff]   ;;  %v3233_v19 = vld [vmem:[#allocation8 + $0x90] sm:$0xff]  }
  0xfe   :  { %1827 = vmatpush1.bf16.msra.mxu0 %v3132_v22  ;;  %1999 = vmatpush1.bf16.msra.mxu1 %v3135_v23  ;;  %v3224_v22 = vld [vmem:[#allocation8] sm:$0xff]  }
  0xff   :  { %1828 = vmatprep.subr.bf16.mxu0 %v3140_v25  ;;  %2000 = vmatprep.subr.bf16.mxu1 %v3143_v26  ;;  %v3225_v23 = vld [vmem:[#allocation8 + $0x80] sm:$0xff]   ;;  %v3227_v25 = vld [vmem:[#allocation8 + $0xc8] sm:$0xff]  }
 0x100   :  { %v3228_v26 = vld [vmem:[#allocation8 + $0x8] sm:$0xff]  }
 0x102   :  { %1829 = vmatpush1.bf16.msra.mxu0 %v3138_v14  ;;  %2001 = vmatpush1.bf16.msra.mxu1 %v3141_v15  ;;  %v3229_v14 = vld [vmem:[#allocation8 + $0x88] sm:$0xff]   ;;  %v3230_v15 = vld [vmem:[#allocation8 + $0x50] sm:$0xff]  }
 0x103   :  { %1830 = vmatprep.subr.bf16.mxu0 %v3146_v27  ;;  %2002 = vmatprep.subr.bf16.mxu1 %v3149_v28  ;;  %v3231_v27 = vld [vmem:[#allocation8 + $0xd0] sm:$0xff]   ;;  %v3234_v28 = vld [vmem:[#allocation8 + $0x58] sm:$0xff]  }
 0x106   :  { %1831 = vmatpush1.bf16.msra.mxu0 %v3144_v29  ;;  %2003 = vmatpush1.bf16.msra.mxu1 %v3147_v30  ;;  %v3235_v29 = vld [vmem:[#allocation8 + $0xd8] sm:$0xff]  }
 0x107   :  { %1832 = vmatprep.subr.bf16.mxu0 %v3152_v31  ;;  %2004 = vmatprep.subr.bf16.mxu1 %v3155_v32  ;;  %v3236_v30 = vld [vmem:[#allocation8 + $0x18] sm:$0xff]   ;;  %v3238_v32 = vld [vmem:[#allocation8 + $0x60] sm:$0xff]  }
 0x108   :  { %v3237_v31 = vld [vmem:[#allocation8 + $0x98] sm:$0xff]  }
 0x10a   :  { %1833 = vmatpush1.bf16.msra.mxu0 %v3150_v33  ;;  %2005 = vmatpush1.bf16.msra.mxu1 %v3153_v34  ;;  %v3239_v33 = vld [vmem:[#allocation8 + $0xe0] sm:$0xff]  }
 0x10b   :  { %1834 = vmatprep.subr.bf16.mxu0 %v3158_v35  ;;  %2006 = vmatprep.subr.bf16.mxu1 %v3161_v36  ;;  %v3240_v34 = vld [vmem:[#allocation8 + $0x20] sm:$0xff]   ;;  %v3242_v36 = vld [vmem:[#allocation8 + $0x68] sm:$0xff]  }
 0x10c   :  { %v3241_v35 = vld [vmem:[#allocation8 + $0xa0] sm:$0xff]  }
 0x10e   :  { %1835 = vmatpush1.bf16.msra.mxu0 %v3156_v37  ;;  %2007 = vmatpush1.bf16.msra.mxu1 %v3159_v38  ;;  %v3243_v37 = vld [vmem:[#allocation8 + $0xe8] sm:$0xff]  }
 0x10f   :  { %1836 = vmatprep.subr.bf16.mxu0 %v3164_v39  ;;  %2008 = vmatprep.subr.bf16.mxu1 %v3167_v40  ;;  %v3244_v38 = vld [vmem:[#allocation8 + $0x28] sm:$0xff]   ;;  %v3246_v40 = vld [vmem:[#allocation8 + $0x70] sm:$0xff]  }
 0x110   :  { %v3245_v39 = vld [vmem:[#allocation8 + $0xa8] sm:$0xff]  }
 0x112   :  { %1837 = vmatpush1.bf16.msra.mxu0 %v3162_v41  ;;  %2009 = vmatpush1.bf16.msra.mxu1 %v3165_v42  ;;  %v3247_v41 = vld [vmem:[#allocation8 + $0xf0] sm:$0xff]  }
 0x113   :  { %1838 = vmatprep.subr.bf16.mxu0 %v3170_v43  ;;  %2010 = vmatprep.subr.bf16.mxu1 %v3173_v44  ;;  %v3248_v42 = vld [vmem:[#allocation8 + $0x30] sm:$0xff]   ;;  %v3250_v44 = vld [vmem:[#allocation8 + $0x78] sm:$0xff]  }
 0x114   :  { %v3249_v43 = vld [vmem:[#allocation8 + $0xb0] sm:$0xff]  }
 0x116   :  { %1839 = vmatpush1.bf16.msra.mxu0 %v3168_v45  ;;  %2011 = vmatpush1.bf16.msra.mxu1 %v3171_v46  ;;  %v3251_v45 = vld [vmem:[#allocation8 + $0xf8] sm:$0xff]  }
 0x117   :  { %1840 = vmatprep.subr.bf16.mxu0 %v3176_v47  ;;  %2012 = vmatprep.subr.bf16.mxu1 %v3179_v48  ;;  %v3252_v46 = vld [vmem:[#allocation8 + $0x38] sm:$0xff]   ;;  %v69_v48 = vlaneseq }
 0x118   :  { %v3253_v47 = vld [vmem:[#allocation8 + $0xb8] sm:$0xff]  }
 0x11a   :  { %1841 = vmatpush1.bf16.msra.mxu0 %v3174_v49  ;;  %2013 = vmatpush1.bf16.msra.mxu1 %v3177_v50  ;;  %v70_v49 = vshrl.u32 %v69_v48, 7 }
 0x11b   :  { %1842 = vmatprep.subr.bf16.mxu0 %v3182_v51  ;;  %2014 = vmatprep.subr.bf16.mxu1 %v3185_v52  ;;  %v67_v52 = vld [vmem:[%s3470_s2] sm:$0xf] }
 0x11c   :  { %v71_v50 = vsub.s32 0, %v70_v49  ;;  %v79_v51 = vsub.s32 2, %v70_v49 }
 0x11e   :  { %1843 = vmatpush1.bf16.msra.mxu0 %v3180_v53  ;;  %2015 = vmatpush1.bf16.msra.mxu1 %v3183_v54  ;;  %v75_v53 = vsub.s32 1, %v70_v49  ;;  %v83_v54 = vsub.s32 3, %v70_v49 }
 0x11f   :  { %1844 = vmatprep.subr.bf16.mxu0 %v3188_v55  ;;  %2016 = vmatprep.subr.bf16.mxu1 %v3191_v56  ;;  %v72_v55 = vrot.slane %v67_v52, %v71_v50  ;;  %v80_v56 = vrot.slane %v67_v52, %v79_v51 }
 0x122   :  { %1845 = vmatpush1.bf16.msra.mxu0 %v3186_v57  ;;  %2017 = vmatpush1.bf16.msra.mxu1 %v3189_v58  ;;  %v76_v57 = vrot.slane %v67_v52, %v75_v53  ;;  %v84_v58 = vrot.slane %v67_v52, %v83_v54 }
 0x123   :  { %1846 = vmatprep.subr.bf16.mxu0 %v3194_v59  ;;  %2018 = vmatprep.subr.bf16.mxu1 %v3197_v60 }
 0x126   :  { %1847 = vmatpush1.bf16.msra.mxu0 %v3192_v61  ;;  %2019 = vmatpush1.bf16.msra.mxu1 %v3195_v62 }
 0x127   :  { %1848 = vmatprep.subr.bf16.mxu0 %v3200_v63  ;;  %2020 = vmatprep.subr.bf16.mxu1 %v3203_v0 }
 0x12a   :  { %1849 = vmatpush1.bf16.msra.mxu0 %v3198_v1  ;;  %2021 = vmatpush1.bf16.msra.mxu1 %v3201_v2 }
 0x12b   :  { %1850 = vmatprep.subr.bf16.mxu0 %v3206_v3  ;;  %2022 = vmatprep.subr.bf16.mxu1 %v3209_v4 }
 0x12e   :  { %1851 = vmatpush1.bf16.msra.mxu0 %v3204_v5  ;;  %2023 = vmatpush1.bf16.msra.mxu1 %v3207_v6 }
 0x12f   :  { %1852 = vmatprep.subr.bf16.mxu0 %v3212_v7  ;;  %2024 = vmatprep.subr.bf16.mxu1 %v3215_v8 }
 0x132   :  { %1853 = vmatpush1.bf16.msra.mxu0 %v3210_v9  ;;  %2025 = vmatpush1.bf16.msra.mxu1 %v3213_v10 }
 0x133   :  { %1854 = vmatprep.subr.bf16.mxu0 %v3218_v11  ;;  %2026 = vmatprep.subr.bf16.mxu1 %v3221_v12 }
 0x136   :  { %1855 = vmatpush1.bf16.msra.mxu0 %v3216_v13  ;;  %2027 = vmatpush1.bf16.msra.mxu1 %v3219_v16 }
 0x137   :  { %2758 = vmatprep.subr.bf16.mxu0 %v3222_v18  ;;  %2780 = vmatprep.subr.bf16.mxu1 %v3223_v20 }
 0x139   :  { %1857 = vmatmul.mubr.bf16.vlgmr.msra.gmra.mrb[0].mxu0 %v2467_v21  ;;  %2029 = vmatmul.mubr.bf16.vlgmr.msra.gmra.mrb[0].mxu1 %v2467_v21 }
 0x13a   :  { %2759 = vmatpush3.bf16.msra.mxu0 %v3224_v22  ;;  %2781 = vmatpush3.bf16.msra.mxu1 %v3225_v23 }
 0x13b   :  { %2760 = vmatprep.subr.bf16.mxu0 %v3226_v24  ;;  %2782 = vmatprep.subr.bf16.mxu1 %v3227_v25 }
 0x13e   :  { %2761 = vmatpush3.bf16.msra.mxu0 %v3228_v26  ;;  %2783 = vmatpush3.bf16.msra.mxu1 %v3229_v14 }
 0x13f   :  { %2762 = vmatprep.subr.bf16.mxu0 %v3230_v15  ;;  %2784 = vmatprep.subr.bf16.mxu1 %v3231_v27  ;;  %v2725_v27 = vld [vmem:[%s3472_s4] ss:$0 sm:$0xff]  ;;  %s3320_s4 = scalar_lea.vmem %s2447_s11, 256 }
 0x140   :  { %p3321_p10 = scmp.ne.s32.totalorder %s2447_s11, %s3320_s4  ;;  %p3326_p12 = scmp.lt.s32.totalorder %s3320_s4, %s3320_s4 }
 0x142   :  { %2763 = vmatpush3.bf16.msra.mxu0 %v3232_v17  ;;  %2785 = vmatpush3.bf16.msra.mxu1 %v3233_v19  ;;  %p3327_p13 = por %p3326_p12, %p3325_p11 }
 0x143   :  { %2764 = vmatprep.subr.bf16.mxu0 %v3234_v28  ;;  %2786 = vmatprep.subr.bf16.mxu1 %v3235_v29 }
 0x144   :  { %p3328_p0 = pnand %p3327_p13, %p3321_p10 }
 0x146   :  { %2765 = vmatpush3.bf16.msra.mxu0 %v3236_v30  ;;  %2787 = vmatpush3.bf16.msra.mxu1 %v3237_v31 }
 0x147   :  { %2766 = vmatprep.subr.bf16.mxu0 %v3238_v32  ;;  %2788 = vmatprep.subr.bf16.mxu1 %v3239_v33 }
 0x14a   :  { %2767 = vmatpush3.bf16.msra.mxu0 %v3240_v34  ;;  %2789 = vmatpush3.bf16.msra.mxu1 %v3241_v35 }
 0x14b   :  { %2768 = vmatprep.subr.bf16.mxu0 %v3242_v36  ;;  %2790 = vmatprep.subr.bf16.mxu1 %v3243_v37 }
 0x14e   :  { %2769 = vmatpush3.bf16.msra.mxu0 %v3244_v38  ;;  %2791 = vmatpush3.bf16.msra.mxu1 %v3245_v39 }
 0x14f   :  { %2770 = vmatprep.subr.bf16.mxu0 %v3246_v40  ;;  %2792 = vmatprep.subr.bf16.mxu1 %v3247_v41 }
 0x152   :  { %2771 = vmatpush3.bf16.msra.mxu0 %v3248_v42  ;;  %2793 = vmatpush3.bf16.msra.mxu1 %v3249_v43 }
 0x153   :  { %2772 = vmatprep.subr.bf16.mxu0 %v3250_v44  ;;  %2794 = vmatprep.subr.bf16.mxu1 %v3251_v45 }
 0x156   :  { %2773 = vmatpush3.bf16.msra.mxu0 %v3252_v46  ;;  %2795 = vmatpush3.bf16.msra.mxu1 %v3253_v47 }
 0x20c   :  { %v1858_v59 = vpop.f32.mrb[0].mxu0  ;;  %v2030_v60 = vpop.f32.mrb[0].mxu1 }
 0x20d   :  { %v2039_v61 = vadd.f32 %v1858_v59, %v72_v55  ;;  %v2041_v62 = vadd.f32 %v2030_v60, %v80_v56  ;;  %v1860_v63 = vpop.f32.mrb[1].mxu0  ;;  %v2032_v0 = vpop.f32.mrb[1].mxu1 }
 0x20e   :  { %v2040_v1 = vadd.f32 %v1860_v63, %v76_v57  ;;  %v2042_v2 = vadd.f32 %v2032_v0, %v84_v58  ;;  %v1862_v3 = vpop.f32.mrb[2].mxu0  ;;  %v2034_v4 = vpop.f32.mrb[2].mxu1 }
 0x20f   :  { %v2043_v5 = vadd.f32 %v1862_v3, %v72_v55  ;;  %v2045_v6 = vadd.f32 %v2034_v4, %v80_v56  ;;  %v1864_v7 = vpop.f32.mrb[3].mxu0  ;;  %v2036_v8 = vpop.f32.mrb[3].mxu1  ;;  %v2066_v11 = vmax.f32 %v2039_v61, 0.0  ;;  %v2068_v12 = vmax.f32 %v2041_v62, 0.0 }
 0x210   :  { %v2044_v9 = vadd.f32 %v1864_v7, %v76_v57  ;;  %v2046_v10 = vadd.f32 %v2036_v8, %v84_v58  ;;  %v2067_v18 = vmax.f32 %v2040_v1, 0.0  ;;  %v2069_v20 = vmax.f32 %v2042_v2, 0.0 }
 0x211   :  { %v2070_v13 = vmax.f32 %v2043_v5, 0.0  ;;  %v2072_v16 = vmax.f32 %v2045_v6, 0.0 }
 0x212   :  { %v2071_v21 = vmax.f32 %v2044_v9, 0.0  ;;  %v2073_v22 = vmax.f32 %v2046_v10, 0.0 }
 0x213   :  { %v2090_v23 = vpack.c.bf16 %v2070_v13, %v2066_v11  ;;  %v2092_v24 = vpack.c.bf16 %v2072_v16, %v2068_v12 }
 0x214   :  { %v2091_v25 = vpack.c.bf16 %v2071_v21, %v2067_v18  ;;  %v2093_v26 = vpack.c.bf16 %v2073_v22, %v2069_v20 }
 0x216   :  { %2389 = vmatprep.mubr.bf16.mxu0 %v2091_v25  ;;  %2430 = vmatprep.mubr.bf16.mxu1 %v2093_v26 }
 0x217   :  { %2390 = vmatmul.mubr.bf16.vlgmr.msra.gmra.mrb[4].mxu0 %v2090_v23  ;;  %2431 = vmatmul.mubr.bf16.vlgmr.msra.gmra.mrb[4].mxu1 %v2092_v24 }
 0x2ea   :  { %v2774_v14 = vpop.f32.mrb[4].mxu0  ;;  %v2796_v15 = vpop.f32.mrb[4].mxu1 }
 0x2eb   :  { %v2775_v17 = vpop.f32.mrb[5].mxu0  ;;  %v2797_v19 = vpop.f32.mrb[5].mxu1 }
 0x2ec   :  { %v2776_v28 = vadd.f32 %v2775_v17, %v2774_v14  ;;  %v2798_v29 = vadd.f32 %v2797_v19, %v2796_v15  ;;  %v2777_v30 = vpop.f32.mrb[6].mxu0  ;;  %v2799_v31 = vpop.f32.mrb[6].mxu1 }
 0x2ed   :  { %v2778_v32 = vpop.f32.mrb[7].mxu0  ;;  %v2800_v33 = vpop.f32.mrb[7].mxu1 }
 0x2ee   :  { %v2392_v34 = vadd.f32 %v2776_v28, %v2725_v27  ;;  %v2779_v35 = vadd.f32 %v2778_v32, %v2777_v30  ;;  %v2801_v36 = vadd.f32 %v2800_v33, %v2799_v31 }
 0x2f0   :  { %v2433_v37 = vadd.f32 %v2798_v29, %v2392_v34  ;;  %v2395_v38 = vadd.f32 %v2779_v35, %v2725_v27 }
 0x2f2   :  { %2439 = vst [vmem:[#allocation9] sm:$0xff] %v2433_v37  ;;  %v2436_v39 = vadd.f32 %v2801_v36, %v2395_v38 }
 0x2f4   :  { %2440 = vst [vmem:[#allocation9 + $0x8] sm:$0xff] %v2436_v39 }
 0x2f5   :  { %3331 = shalt.err (!%p3328_p0)
}
 0x2f6   :  { %s3332_s14 = scalar_lea.hbm %s3473_s5, 256 }
 0x2f7   :  { %p3333_p1 = scmp.ne.s32.totalorder %s3473_s5, %s3332_s14  ;;  %p3336_p2 = scmp.lt.u32.totalorder %s3332_s14, %s3473_s5 }
 0x2f9   :  { %p3338_p3 = pnand %p3336_p2, %p3333_p1 }
 0x2fb   :  { %3341 = shalt.err (!%p3338_p3)
}
 0x2fc   :  { %s3358_s18 = smov 128   ;;  %s3359_s19 = smov 8  }
 0x2fd   :  { %2452 = dma.vmem_to_hbm [thread:$0]  %s2447_s11, 256, %s3473_s5, [#allocation5], %s3358_s18, %s3358_s18, %s3359_s19  }
 0x2fe   :  { %3346 = dma.done.wait [#allocation5], 256  }
 0x2ff   :  { %3347 = vsyncadd [#allocation5], 4294967040 }
 0x300   :  { %2456 = vsyncpa [#allocation4], 1 }
 0x301   :  { %2457 = vsyncpa [#allocation7], 1 }
 0x302   :  { %2458 = vsyncpa [#allocation5], 1 }

</bundles_post_ra>
